<compile_context>
chip_gen: v6e
topology: v6e:2x2x1
jax: 0.10.0
libtpu: 0.0.40
codegen_flags: <defaults>
</compile_context>

<pallas_src>
import math
from functools import lru_cache, partial

import jax
import jax.numpy as jnp
from jax import lax
from jax.experimental import pallas as pl
from jax.experimental.pallas import tpu as pltpu

LN_EPS = 1e-5


@lru_cache(maxsize=None)
def _vmem_limit_bytes():
    # generation-aware budget: ~96 MiB on v5e/v6e (128 MiB VMEM), ~48 MiB on v7x (64 MiB)
    try:
        cap = pltpu.get_tpu_info().vmem_capacity_bytes
    except Exception:
        cap = 64 * 1024 * 1024
    return int(min(cap * 3 // 4, 100 * 1024 * 1024))


def _full_spec(arr):
    # whole-array VMEM block, same block for every grid step -> stays resident
    return pl.BlockSpec(arr.shape, lambda *_: (0,) * arr.ndim)


def _pick_tile(n, target, quantum):
    # largest divisor of n that is a multiple of `quantum` and <= target; else full n
    best = None
    for d in range(quantum, min(n, target) + 1, quantum):
        if n % d == 0:
            best = d
    return best if best is not None else n


# ----------------------------- Pallas kernels ------------------------------

def _embed_kernel(ids_ref, emb_hbm, pe_ref, o_ref, rows_vmem, sem, *, scale, batch):
    # out[b, s, :] = emb[src[s, b]] * sqrt(E) + pe[s]     (one batch element per step)
    # Token rows are gathered from the HBM-resident embedding table with manual DMAs.
    b = pl.program_id(0)
    S = rows_vmem.shape[0]

    @pl.loop(0, S)
    def _issue(s):
        tok = ids_ref[s * batch + b]
        pltpu.make_async_copy(emb_hbm.at[tok], rows_vmem.at[s], sem.at[s]).start()

    @pl.loop(0, S)
    def _wait(s):
        pltpu.make_async_copy(emb_hbm.at[0], rows_vmem.at[s], sem.at[s]).wait()

    # TODO(synk): for very long S, chunk the gather (TILE_S rows at a time,
    # double-buffered) to bound the number of outstanding DMAs.
    o_ref[0] = (rows_vmem[...] * scale + pe_ref[...]).astype(o_ref.dtype)


def _layer_kernel(x_ref, wqkv_ref, bqkv_ref, wo_ref, bo_ref, g1_ref, bln1_ref,
                  w1_ref, b1_ref, w2_ref, b2_ref, g2_ref, bln2_ref, o_ref,
                  *, nhead, scale, eps):
    # Fused TransformerEncoderLayer (post-norm):
    #   QKV proj -> batched-head masked softmax attention -> out proj -> +res -> LN1
    #   -> FF1 + ReLU -> FF2 -> +res -> LN2                (one batch element per step)
    S, E = x_ref.shape[1], x_ref.shape[2]
    dk = E // nhead

    xb = x_ref[0]                                    # (S, E) bf16
    x = xb.astype(jnp.float32)

    # ---- attention ----
    qkv = lax.dot_general(xb, wqkv_ref[...], (((1,), (1,)), ((), ())),
                          preferred_element_type=jnp.float32) + bqkv_ref[...]
    qkvb = qkv.astype(jnp.bfloat16)                  # (S, 3E)

    # head split via static lane slices; heads batched on a leading axis
    q3 = jnp.stack([qkvb[:, h * dk:(h + 1) * dk] for h in range(nhead)], axis=0)
    k3 = jnp.stack([qkvb[:, E + h * dk:E + (h + 1) * dk] for h in range(nhead)], axis=0)
    v3 = jnp.stack([qkvb[:, 2 * E + h * dk:2 * E + (h + 1) * dk] for h in range(nhead)],
                   axis=0)                            # each (nhead, S, dk) bf16

    # scores for all heads in one batched MXU call: (nhead, S, S) f32
    s = lax.dot_general(q3, k3, (((2,), (2,)), ((0,), (0,))),
                        preferred_element_type=jnp.float32) * scale

    # causal mask generated in-kernel (no (S,S) HBM mask DMA)
    # TODO(synk): arbitrary additive src_mask would be passed as an extra VMEM input.
    row = lax.broadcasted_iota(jnp.int32, (S, S), 0)
    col = lax.broadcasted_iota(jnp.int32, (S, S), 1)
    s = jnp.where((col <= row)[None, :, :], s, -1e30)

    # f32 softmax statistics; EUP reciprocal for the denominator
    s = s - jnp.max(s, axis=-1, keepdims=True)
    p = jnp.exp(s)
    p = p * pl.reciprocal(jnp.sum(p, axis=-1, keepdims=True), approx=True)

    # TODO(synk): for long sequences, query-tile + stream K/V with online softmax
    # (flash-style) instead of dense (nhead, S, S) scores.
    hv = lax.dot_general(p.astype(jnp.bfloat16), v3, (((2,), (1,)), ((0,), (0,))),
                         preferred_element_type=jnp.float32)   # (nhead, S, dk)

    # concat heads -> (S, E); ONE full-E output projection (K = E, not K = dk)
    cat = jnp.concatenate([hv[h] for h in range(nhead)], axis=-1)
    attn = lax.dot_general(cat.astype(jnp.bfloat16), wo_ref[...],
                           (((1,), (1,)), ((), ())),
                           preferred_element_type=jnp.float32) + bo_ref[...]

    # residual + LayerNorm 1 (f32)
    r = x + attn
    mu = jnp.mean(r, axis=-1, keepdims=True)
    var = jnp.mean((r - mu) ** 2, axis=-1, keepdims=True)
    x1 = (r - mu) * lax.rsqrt(var + eps) * g1_ref[...] + bln1_ref[...]

    # ---- FFN ----
    h1 = lax.dot_general(x1.astype(jnp.bfloat16), w1_ref[...],
                         (((1,), (1,)), ((), ())),
                         preferred_element_type=jnp.float32) + b1_ref[...]
    h1 = jnp.maximum(h1, 0.0)
    y = lax.dot_general(h1.astype(jnp.bfloat16), w2_ref[...],
                        (((1,), (1,)), ((), ())),
                        preferred_element_type=jnp.float32) + b2_ref[...]

    # residual + LayerNorm 2 (f32), write bf16 activation
    r2 = x1 + y
    mu2 = jnp.mean(r2, axis=-1, keepdims=True)
    var2 = jnp.mean((r2 - mu2) ** 2, axis=-1, keepdims=True)
    o_ref[0] = ((r2 - mu2) * lax.rsqrt(var2 + eps) * g2_ref[...]
                + bln2_ref[...]).astype(o_ref.dtype)


def _decoder_kernel(x_ref, w_ref, b_ref, o_ref):
    # logits tile = x_rows @ dec_w_tile^T + dec_b_tile    (row-tile x vocab-tile grid)
    o_ref[...] = (lax.dot_general(x_ref[...], w_ref[...], (((1,), (1,)), ((), ())),
                                  preferred_element_type=jnp.float32)
                  + b_ref[...])


# ----------------------------- wrappers ------------------------------------

def embed(src, emb, pe, *, scale):
    S, B = src.shape
    E = emb.shape[1]
    ids = src.reshape(-1)                            # 1-D SMEM prefetch (no 2-D padding)
    return pl.pallas_call(
        partial(_embed_kernel, scale=scale, batch=B),
        out_shape=jax.ShapeDtypeStruct((B, S, E), jnp.bfloat16),
        grid_spec=pltpu.PrefetchScalarGridSpec(
            num_scalar_prefetch=1,
            grid=(B,),
            in_specs=[
                pl.BlockSpec(memory_space=pl.ANY),              # embedding table in HBM
                pl.BlockSpec((S, E), lambda b, ids: (0, 0)),    # PE rows [0:S], resident
            ],
            out_specs=pl.BlockSpec((1, S, E), lambda b, ids: (b, 0, 0)),
            scratch_shapes=[pltpu.VMEM((S, E), jnp.float32),
                            pltpu.SemaphoreType.DMA((S,))]),
        compiler_params=pltpu.CompilerParams(
            dimension_semantics=("parallel",),
            vmem_limit_bytes=_vmem_limit_bytes()),
    )(ids, emb, pe)


def encoder_layer(x, layer, *, nhead, eps=LN_EPS):
    B, S, E = x.shape
    assert E % nhead == 0
    scale = 1.0 / math.sqrt(E // nhead)
    ins = [x,
           layer["in_proj_w"], layer["in_proj_b"],
           layer["out_proj_w"], layer["out_proj_b"],
           layer["ln1_g"], layer["ln1_b"],
           layer["ff1_w"], layer["ff1_b"],
           layer["ff2_w"], layer["ff2_b"],
           layer["ln2_g"], layer["ln2_b"]]
    in_specs = ([pl.BlockSpec((1, S, E), lambda b: (b, 0, 0))]
                + [_full_spec(a) for a in ins[1:]])
    return pl.pallas_call(
        partial(_layer_kernel, nhead=nhead, scale=scale, eps=eps),
        out_shape=jax.ShapeDtypeStruct((B, S, E), jnp.bfloat16),
        grid=(B,),
        in_specs=in_specs,
        out_specs=pl.BlockSpec((1, S, E), lambda b: (b, 0, 0)),
        compiler_params=pltpu.CompilerParams(
            dimension_semantics=("parallel",),
            vmem_limit_bytes=_vmem_limit_bytes()),
    )(*ins)


def decode(x_rows, w, b, *, tile_r=256, tile_v=2048):
    # x_rows: (R, E) bf16 rows already in (S, B) order; w: (V, E); b: (1, V)
    R, E = x_rows.shape
    V = w.shape[0]
    tr = _pick_tile(R, tile_r, 8)
    tv = _pick_tile(V, tile_v, 128)
    return pl.pallas_call(
        _decoder_kernel,
        out_shape=jax.ShapeDtypeStruct((R, V), jnp.float32),
        grid=(R // tr, V // tv),
        in_specs=[pl.BlockSpec((tr, E), lambda r, v: (r, 0)),
                  pl.BlockSpec((tv, E), lambda r, v: (v, 0)),   # vocab-tiled weight
                  pl.BlockSpec((1, tv), lambda r, v: (0, v))],
        out_specs=pl.BlockSpec((tr, tv), lambda r, v: (r, v)),
        compiler_params=pltpu.CompilerParams(
            dimension_semantics=("parallel", "parallel"),
            vmem_limit_bytes=_vmem_limit_bytes()),
    )(x_rows, w, b)


# ----------------------------- model pieces --------------------------------

def sinusoidal_pe(max_len, d_model):
    # standard sinusoidal PE (the reference __init__ is typo-ridden; this is the intent)
    position = jnp.arange(max_len, dtype=jnp.float32)[:, None]
    div_term = jnp.exp(
        jnp.arange(0, d_model, 2, dtype=jnp.float32) * (-math.log(10000.0) / d_model))
    pe = jnp.zeros((max_len, d_model), jnp.float32)
    pe = pe.at[:, 0::2].set(jnp.sin(position * div_term))
    pe = pe.at[:, 1::2].set(jnp.cos(position * div_term))
    return pe


def generate_square_subsequent_mask(sz):
    # matches Model.generate_square_subsequent_mask: 0 on/below diag, -inf above
    upper = jnp.triu(jnp.ones((sz, sz), jnp.float32), k=1)
    return jnp.where(upper == 1.0, -jnp.inf, 0.0).astype(jnp.float32)


def init_params(key, ntoken, ninp, nhid, nlayers, max_len=512):
    initrange = 0.1
    kit = iter(jax.random.split(key, 2 + 6 * nlayers))

    def u(shape, bound):
        return jax.random.uniform(next(kit), shape, jnp.float32, -bound, bound)

    params = {
        "emb": u((ntoken, ninp), initrange),                       # f32, gathered by DMA
        "dec_w": u((ntoken, ninp), initrange).astype(jnp.bfloat16),
        "dec_b": jnp.zeros((1, ntoken), jnp.float32),
        "pe": sinusoidal_pe(max_len, ninp),
        "layers": [],
    }
    b_e = 1.0 / math.sqrt(ninp)
    b_h = 1.0 / math.sqrt(nhid)
    for _ in range(nlayers):
        params["layers"].append({
            "in_proj_w": u((3 * ninp, ninp), b_e).astype(jnp.bfloat16),
            "in_proj_b": jnp.zeros((1, 3 * ninp), jnp.float32),
            "out_proj_w": u((ninp, ninp), b_e).astype(jnp.bfloat16),
            "out_proj_b": jnp.zeros((1, ninp), jnp.float32),
            "ff1_w": u((nhid, ninp), b_e).astype(jnp.bfloat16),
            "ff1_b": u((1, nhid), b_e),
            "ff2_w": u((ninp, nhid), b_h).astype(jnp.bfloat16),
            "ff2_b": u((1, ninp), b_h),
            "ln1_g": jnp.ones((1, ninp), jnp.float32),
            "ln1_b": jnp.zeros((1, ninp), jnp.float32),
            "ln2_g": jnp.ones((1, ninp), jnp.float32),
            "ln2_b": jnp.zeros((1, ninp), jnp.float32),
        })
    return params


def model_forward(params, src, src_mask, *, nhead):
    # src: (S, B) int32 token ids; src_mask: (S, S) additive causal mask.
    # The causal mask is regenerated inside the attention kernel (src_mask is assumed
    # to be Model.generate_square_subsequent_mask(S), as in the reference usage).
    # TODO(synk): dropout layers omitted (eval-mode identity).
    S, B = src.shape
    E = params["emb"].shape[1]
    x = embed(src, params["emb"], params["pe"], scale=math.sqrt(E))   # (B, S, E) bf16
    for layer in params["layers"]:
        x = encoder_layer(x, layer, nhead=nhead)                      # fused per-layer
    # Transpose the SMALL bf16 activation (not the huge logits) so the decoder can
    # emit the (S, B, V) layout directly; reshapes below are metadata-only.
    x_rows = jnp.transpose(x, (1, 0, 2)).reshape(S * B, E)            # (S*B, E) bf16
    logits = decode(x_rows, params["dec_w"], params["dec_b"])         # (S*B, V) f32
    return logits.reshape(S, B, -1)                                   # (S, B, V)


# ----------------------- pure-JAX reference (f32) ---------------------------

def _ln_ref(h, g, b, eps=LN_EPS):
    mu = jnp.mean(h, axis=-1, keepdims=True)
    var = jnp.mean((h - mu) ** 2, axis=-1, keepdims=True)
    return (h - mu) / jnp.sqrt(var + eps) * g + b


def reference_forward(params, src, src_mask, *, nhead):
    S, B = src.shape
    E = params["emb"].shape[1]
    dk = E // nhead
    f32 = lambda a: a.astype(jnp.float32)

    x = params["emb"][src] * math.sqrt(E) + params["pe"][:S][:, None, :]  # (S,B,E)
    for layer in params["layers"]:
        qkv = x @ f32(layer["in_proj_w"]).T + layer["in_proj_b"][0]
        q, k, v = jnp.split(qkv, 3, axis=-1)
        heads = lambda t: t.reshape(S, B, nhead, dk).transpose(1, 2, 0, 3)
        qh, kh, vh = heads(q), heads(k), heads(v)
        s = jnp.einsum("bhqd,bhkd->bhqk", qh, kh) / math.sqrt(dk) + src_mask
        p = jax.nn.softmax(s, axis=-1)
        o = jnp.einsum("bhqk,bhkd->bhqd", p, vh)
        o = o.transpose(2, 0, 1, 3).reshape(S, B, E)
        attn = o @ f32(layer["out_proj_w"]).T + layer["out_proj_b"][0]
        x = _ln_ref(x + attn, layer["ln1_g"][0], layer["ln1_b"][0])
        h = jax.nn.relu(x @ f32(layer["ff1_w"]).T + layer["ff1_b"][0])
        y = h @ f32(layer["ff2_w"]).T + layer["ff2_b"][0]
        x = _ln_ref(x + y, layer["ln2_g"][0], layer["ln2_b"][0])
    return x @ f32(params["dec_w"]).T + params["dec_b"][0]


if __name__ == "__main__":
    # small but lane-dense shapes (E, 3E, nhid, V multiples of 128)
    ntoken, ninp, nhead, nhid, nlayers = 128, 128, 4, 256, 2
    S, B = 16, 2

    key = jax.random.PRNGKey(0)
    pkey, skey = jax.random.split(key)
    params = init_params(pkey, ntoken, ninp, nhid, nlayers)

    src = jax.random.randint(skey, (S, B), 0, ntoken, dtype=jnp.int32)
    src_mask = generate_square_subsequent_mask(S)

    fwd = jax.jit(partial(model_forward, nhead=nhead))
    out = jax.block_until_ready(fwd(params, src, src_mask))

    assert out.shape == (S, B, ntoken)
    assert bool(jnp.all(jnp.isfinite(out)))

    ref = reference_forward(params, src, src_mask, nhead=nhead)
    max_err = float(jnp.max(jnp.abs(out - ref)))
    assert max_err < 0.15, f"mismatch vs f32 reference: {max_err}"

    print("KERNEL_OK")
</pallas_src>

<mosaic_0001>
module attributes {stable_mosaic.version = 11 : i64} {
  func.func @_embed_kernel(%arg0: i32, %arg1: memref<32xi32, #tpu.memory_space<smem>>, %arg2: memref<128x128xf32, #tpu.memory_space<any>>, %arg3: memref<16x128xf32, #tpu.memory_space<vmem>>, %arg4: memref<1x16x128xbf16, #tpu.memory_space<vmem>>, %arg5: memref<16x128xf32, #tpu.memory_space<vmem>>, %arg6: memref<16x!tpu.dma_semaphore, #tpu.memory_space<semaphore_mem>>) attributes {dimension_semantics = [#tpu.dimension_semantics<parallel>], iteration_bounds = array<i64: 2>, scalar_prefetch = 1 : i64, scratch_operands = 2 : i64, tpu.core_type = #tpu.core_type<tc>, window_params = [{}, {transform_indices = @transform_1, window_bounds = array<i64: 16, 128>}, {transform_indices = @transform_2, window_bounds = array<i64: 1, 16, 128>}]} {
    %c0_i32 = arith.constant 0 : i32
    %c16_i32 = arith.constant 16 : i32
    %0 = arith.addi %c0_i32, %c16_i32 : i32
    %c1_i32 = arith.constant 1 : i32
    scf.for %arg7 = %c0_i32 to %0 step %c1_i32  : i32 {
      %c1_i32_11 = arith.constant 1 : i32
      %11 = arith.muli %arg7, %c1_i32_11 : i32
      %c0_i32_12 = arith.constant 0 : i32
      %12 = arith.addi %c0_i32_12, %11 : i32
      %c2_i32 = arith.constant 2 : i32
      %13 = arith.muli %12, %c2_i32 : i32
      %14 = arith.addi %13, %arg0 : i32
      %15 = arith.index_cast %14 : i32 to index
      %16 = memref.load %arg1[%15] : memref<32xi32, #tpu.memory_space<smem>>
      %c0_i32_13 = arith.constant 0 : i32
      %17 = tpu.memref_slice %arg2[%16, %c0_i32_13] : memref<128x128xf32, #tpu.memory_space<any>> -> memref<1x128xf32, #tpu.memory_space<any>>
      %18 = tpu.memref_squeeze %17 : memref<1x128xf32, #tpu.memory_space<any>> -> memref<128xf32, #tpu.memory_space<any>>
      %c0_i32_14 = arith.constant 0 : i32
      %19 = tpu.memref_slice %arg5[%12, %c0_i32_14] : memref<16x128xf32, #tpu.memory_space<vmem>> -> memref<1x128xf32, #tpu.memory_space<vmem>>
      %20 = tpu.memref_squeeze %19 : memref<1x128xf32, #tpu.memory_space<vmem>> -> memref<128xf32, #tpu.memory_space<vmem>>
      %21 = tpu.memref_slice %arg6[%12] : memref<16x!tpu.dma_semaphore, #tpu.memory_space<semaphore_mem>> -> memref<1x!tpu.dma_semaphore, #tpu.memory_space<semaphore_mem>>
      %22 = tpu.memref_squeeze %21 : memref<1x!tpu.dma_semaphore, #tpu.memory_space<semaphore_mem>> -> memref<!tpu.dma_semaphore, #tpu.memory_space<semaphore_mem>>
      tpu.enqueue_dma source(%18 : memref<128xf32, #tpu.memory_space<any>>) target(%20 : memref<128xf32, #tpu.memory_space<vmem>>) target_semaphore(%22 : memref<!tpu.dma_semaphore, #tpu.memory_space<semaphore_mem>>)
    }
    %c16_i32_0 = arith.constant 16 : i32
    %c0_i32_1 = arith.constant 0 : i32
    %c16_i32_2 = arith.constant 16 : i32
    %1 = arith.addi %c0_i32_1, %c16_i32_2 : i32
    %c1_i32_3 = arith.constant 1 : i32
    scf.for %arg7 = %c0_i32_1 to %1 step %c1_i32_3  : i32 {
      %c1_i32_11 = arith.constant 1 : i32
      %11 = arith.muli %arg7, %c1_i32_11 : i32
      %c0_i32_12 = arith.constant 0 : i32
      %12 = arith.addi %c0_i32_12, %11 : i32
      %c0_i32_13 = arith.constant 0 : i32
      %c0_i32_14 = arith.constant 0 : i32
      %13 = tpu.memref_slice %arg2[%c0_i32_13, %c0_i32_14] : memref<128x128xf32, #tpu.memory_space<any>> -> memref<1x128xf32, #tpu.memory_space<any>>
      %14 = tpu.memref_squeeze %13 : memref<1x128xf32, #tpu.memory_space<any>> -> memref<128xf32, #tpu.memory_space<any>>
      %c0_i32_15 = arith.constant 0 : i32
      %15 = tpu.memref_slice %arg5[%12, %c0_i32_15] : memref<16x128xf32, #tpu.memory_space<vmem>> -> memref<1x128xf32, #tpu.memory_space<vmem>>
      %16 = tpu.memref_squeeze %15 : memref<1x128xf32, #tpu.memory_space<vmem>> -> memref<128xf32, #tpu.memory_space<vmem>>
      %17 = tpu.memref_slice %arg6[%12] : memref<16x!tpu.dma_semaphore, #tpu.memory_space<semaphore_mem>> -> memref<1x!tpu.dma_semaphore, #tpu.memory_space<semaphore_mem>>
      %18 = tpu.memref_squeeze %17 : memref<1x!tpu.dma_semaphore, #tpu.memory_space<semaphore_mem>> -> memref<!tpu.dma_semaphore, #tpu.memory_space<semaphore_mem>>
      tpu.wait_dma2 semaphore(%18 : memref<!tpu.dma_semaphore, #tpu.memory_space<semaphore_mem>>) src(%14 : memref<128xf32, #tpu.memory_space<any>>) dst(%16 : memref<128xf32, #tpu.memory_space<vmem>>)
    }
    %c16_i32_4 = arith.constant 16 : i32
    %c0 = arith.constant 0 : index
    %c0_5 = arith.constant 0 : index
    %2 = vector.load %arg5[%c0, %c0_5] : memref<16x128xf32, #tpu.memory_space<vmem>>, vector<16x128xf32>
    %cst = arith.constant 11.3137083 : f32
    %3 = vector.broadcast %cst : f32 to vector<16x128xf32>
    %4 = arith.mulf %2, %3 : vector<16x128xf32>
    %c0_6 = arith.constant 0 : index
    %c0_7 = arith.constant 0 : index
    %5 = vector.load %arg3[%c0_6, %c0_7] : memref<16x128xf32, #tpu.memory_space<vmem>>, vector<16x128xf32>
    %6 = arith.addf %4, %5 : vector<16x128xf32>
    %7 = arith.truncf %6 : vector<16x128xf32> to vector<16x128xbf16>
    %c0_8 = arith.constant 0 : index
    %c0_9 = arith.constant 0 : index
    %c0_10 = arith.constant 0 : index
    %8 = vector.load %arg4[%c0_8, %c0_9, %c0_10] : memref<1x16x128xbf16, #tpu.memory_space<vmem>>, vector<1x16x128xbf16>
    %9 = vector.shape_cast %8 : vector<1x16x128xbf16> to vector<16x128xbf16>
    %10 = vector.shape_cast %7 : vector<16x128xbf16> to vector<1x16x128xbf16>
    tpu.vector_store %arg4[%c0_8, %c0_9, %c0_10], %10 {strides = array<i32>} : memref<1x16x128xbf16, #tpu.memory_space<vmem>>, vector<1x16x128xbf16>,
    return
  }
  func.func @transform_1(%arg0: i32, %arg1: memref<32xi32, #tpu.memory_space<smem>>) -> (i32, i32) {
    %c0_i32 = arith.constant 0 : i32
    %c0_i32_0 = arith.constant 0 : i32
    %c0_i32_1 = arith.constant 0 : i32
    return %c0_i32, %c0_i32_0 : i32, i32
  }
  func.func @transform_2(%arg0: i32, %arg1: memref<32xi32, #tpu.memory_space<smem>>) -> (i32, i32, i32) {
    %c0_i32 = arith.constant 0 : i32
    %c0_i32_0 = arith.constant 0 : i32
    %c0_i32_1 = arith.constant 0 : i32
    return %arg0, %c0_i32, %c0_i32_0 : i32, i32, i32
  }
}

module attributes {stable_mosaic.version = 11 : i64} {
  func.func @_layer_kernel(%arg0: i32, %arg1: memref<1x16x128xbf16, #tpu.memory_space<vmem>>, %arg2: memref<384x128xbf16, #tpu.memory_space<vmem>>, %arg3: memref<1x384xf32, #tpu.memory_space<vmem>>, %arg4: memref<128x128xbf16, #tpu.memory_space<vmem>>, %arg5: memref<1x128xf32, #tpu.memory_space<vmem>>, %arg6: memref<1x128xf32, #tpu.memory_space<vmem>>, %arg7: memref<1x128xf32, #tpu.memory_space<vmem>>, %arg8: memref<256x128xbf16, #tpu.memory_space<vmem>>, %arg9: memref<1x256xf32, #tpu.memory_space<vmem>>, %arg10: memref<128x256xbf16, #tpu.memory_space<vmem>>, %arg11: memref<1x128xf32, #tpu.memory_space<vmem>>, %arg12: memref<1x128xf32, #tpu.memory_space<vmem>>, %arg13: memref<1x128xf32, #tpu.memory_space<vmem>>, %arg14: memref<1x16x128xbf16, #tpu.memory_space<vmem>>) attributes {dimension_semantics = [#tpu.dimension_semantics<parallel>], iteration_bounds = array<i64: 2>, scalar_prefetch = 0 : i64, scratch_operands = 0 : i64, tpu.core_type = #tpu.core_type<tc>, window_params = [{transform_indices = @transform_0, window_bounds = array<i64: 1, 16, 128>}, {pipeline_mode = #tpu.pipeline_mode<synchronous>, transform_indices = @transform_1, window_bounds = array<i64: 384, 128>}, {pipeline_mode = #tpu.pipeline_mode<synchronous>, transform_indices = @transform_2, window_bounds = array<i64: 1, 384>}, {pipeline_mode = #tpu.pipeline_mode<synchronous>, transform_indices = @transform_3, window_bounds = array<i64: 128, 128>}, {pipeline_mode = #tpu.pipeline_mode<synchronous>, transform_indices = @transform_4, window_bounds = array<i64: 1, 128>}, {pipeline_mode = #tpu.pipeline_mode<synchronous>, transform_indices = @transform_5, window_bounds = array<i64: 1, 128>}, {pipeline_mode = #tpu.pipeline_mode<synchronous>, transform_indices = @transform_6, window_bounds = array<i64: 1, 128>}, {pipeline_mode = #tpu.pipeline_mode<synchronous>, transform_indices = @transform_7, window_bounds = array<i64: 256, 128>}, {pipeline_mode = #tpu.pipeline_mode<synchronous>, transform_indices = @transform_8, window_bounds = array<i64: 1, 256>}, {pipeline_mode = #tpu.pipeline_mode<synchronous>, transform_indices = @transform_9, window_bounds = array<i64: 128, 256>}, {pipeline_mode = #tpu.pipeline_mode<synchronous>, transform_indices = @transform_10, window_bounds = array<i64: 1, 128>}, {pipeline_mode = #tpu.pipeline_mode<synchronous>, transform_indices = @transform_11, window_bounds = array<i64: 1, 128>}, {pipeline_mode = #tpu.pipeline_mode<synchronous>, transform_indices = @transform_12, window_bounds = array<i64: 1, 128>}, {transform_indices = @transform_13, window_bounds = array<i64: 1, 16, 128>}]} {
    %c0 = arith.constant 0 : index
    %c0_0 = arith.constant 0 : index
    %c0_1 = arith.constant 0 : index
    %0 = vector.load %arg1[%c0, %c0_0, %c0_1] : memref<1x16x128xbf16, #tpu.memory_space<vmem>>, vector<1x16x128xbf16>
    %1 = vector.shape_cast %0 : vector<1x16x128xbf16> to vector<16x128xbf16>
    %2 = arith.extf %1 : vector<16x128xbf16> to vector<16x128xf32>
    %c0_2 = arith.constant 0 : index
    %c0_3 = arith.constant 0 : index
    %3 = vector.load %arg2[%c0_2, %c0_3] : memref<384x128xbf16, #tpu.memory_space<vmem>>, vector<384x128xbf16>
    %cst = arith.constant dense<0.000000e+00> : vector<16x384xf32>
    %4 = tpu.matmul %1, %3, %cst {dimension_numbers = #tpu.dot_dimension_numbers<[1], [1], [0], [0], [0, 0, 1, 0], [], []>} : vector<16x128xbf16>, vector<384x128xbf16>, vector<16x384xf32> -> vector<16x384xf32>
    %c0_4 = arith.constant 0 : index
    %c0_5 = arith.constant 0 : index
    %5 = vector.load %arg3[%c0_4, %c0_5] : memref<1x384xf32, #tpu.memory_space<vmem>>, vector<1x384xf32>
    %6 = vector.broadcast %5 : vector<1x384xf32> to vector<16x384xf32>
    %7 = arith.addf %4, %6 : vector<16x384xf32>
    %8 = arith.truncf %7 : vector<16x384xf32> to vector<16x384xbf16>
    %9 = vector.extract_strided_slice %8 {offsets = [0, 0], sizes = [16, 32], strides = [1, 1]} : vector<16x384xbf16> to vector<16x32xbf16>
    %10 = vector.extract_strided_slice %8 {offsets = [0, 32], sizes = [16, 32], strides = [1, 1]} : vector<16x384xbf16> to vector<16x32xbf16>
    %11 = vector.extract_strided_slice %8 {offsets = [0, 64], sizes = [16, 32], strides = [1, 1]} : vector<16x384xbf16> to vector<16x32xbf16>
    %12 = vector.extract_strided_slice %8 {offsets = [0, 96], sizes = [16, 32], strides = [1, 1]} : vector<16x384xbf16> to vector<16x32xbf16>
    %13 = vector.shape_cast %9 : vector<16x32xbf16> to vector<1x16x32xbf16>
    %14 = vector.shape_cast %10 : vector<16x32xbf16> to vector<1x16x32xbf16>
    %15 = vector.shape_cast %11 : vector<16x32xbf16> to vector<1x16x32xbf16>
    %16 = vector.shape_cast %12 : vector<16x32xbf16> to vector<1x16x32xbf16>
    %17 = tpu.concatenate %13, %14, %15, %16 in 0 : vector<1x16x32xbf16>, vector<1x16x32xbf16>, vector<1x16x32xbf16>, vector<1x16x32xbf16> -> vector<4x16x32xbf16>
    %18 = vector.extract_strided_slice %8 {offsets = [0, 128], sizes = [16, 32], strides = [1, 1]} : vector<16x384xbf16> to vector<16x32xbf16>
    %19 = vector.extract_strided_slice %8 {offsets = [0, 160], sizes = [16, 32], strides = [1, 1]} : vector<16x384xbf16> to vector<16x32xbf16>
    %20 = vector.extract_strided_slice %8 {offsets = [0, 192], sizes = [16, 32], strides = [1, 1]} : vector<16x384xbf16> to vector<16x32xbf16>
    %21 = vector.extract_strided_slice %8 {offsets = [0, 224], sizes = [16, 32], strides = [1, 1]} : vector<16x384xbf16> to vector<16x32xbf16>
    %22 = vector.shape_cast %18 : vector<16x32xbf16> to vector<1x16x32xbf16>
    %23 = vector.shape_cast %19 : vector<16x32xbf16> to vector<1x16x32xbf16>
    %24 = vector.shape_cast %20 : vector<16x32xbf16> to vector<1x16x32xbf16>
    %25 = vector.shape_cast %21 : vector<16x32xbf16> to vector<1x16x32xbf16>
    %26 = tpu.concatenate %22, %23, %24, %25 in 0 : vector<1x16x32xbf16>, vector<1x16x32xbf16>, vector<1x16x32xbf16>, vector<1x16x32xbf16> -> vector<4x16x32xbf16>
    %27 = vector.extract_strided_slice %8 {offsets = [0, 256], sizes = [16, 32], strides = [1, 1]} : vector<16x384xbf16> to vector<16x32xbf16>
    %28 = vector.extract_strided_slice %8 {offsets = [0, 288], sizes = [16, 32], strides = [1, 1]} : vector<16x384xbf16> to vector<16x32xbf16>
    %29 = vector.extract_strided_slice %8 {offsets = [0, 320], sizes = [16, 32], strides = [1, 1]} : vector<16x384xbf16> to vector<16x32xbf16>
    %30 = vector.extract_strided_slice %8 {offsets = [0, 352], sizes = [16, 32], strides = [1, 1]} : vector<16x384xbf16> to vector<16x32xbf16>
    %31 = vector.shape_cast %27 : vector<16x32xbf16> to vector<1x16x32xbf16>
    %32 = vector.shape_cast %28 : vector<16x32xbf16> to vector<1x16x32xbf16>
    %33 = vector.shape_cast %29 : vector<16x32xbf16> to vector<1x16x32xbf16>
    %34 = vector.shape_cast %30 : vector<16x32xbf16> to vector<1x16x32xbf16>
    %35 = tpu.concatenate %31, %32, %33, %34 in 0 : vector<1x16x32xbf16>, vector<1x16x32xbf16>, vector<1x16x32xbf16>, vector<1x16x32xbf16> -> vector<4x16x32xbf16>
    %cst_6 = arith.constant dense<0.000000e+00> : vector<4x16x16xf32>
    %36 = tpu.matmul %17, %26, %cst_6 {dimension_numbers = #tpu.dot_dimension_numbers<[2], [2], [1], [1], [0, 0, 0, 1, 1, 1], [0], [0]>} : vector<4x16x32xbf16>, vector<4x16x32xbf16>, vector<4x16x16xf32> -> vector<4x16x16xf32>
    %cst_7 = arith.constant 0.176776692 : f32
    %37 = vector.broadcast %cst_7 : f32 to vector<4x16x16xf32>
    %38 = arith.mulf %36, %37 : vector<4x16x16xf32>
    %39 = tpu.iota {dimensions = array<i32: 0>} : vector<16x16xi32>
    %40 = tpu.iota {dimensions = array<i32: 1>} : vector<16x16xi32>
    %41 = arith.cmpi sle, %40, %39 : vector<16x16xi32>
    %42 = vector.shape_cast %41 : vector<16x16xi1> to vector<1x16x16xi1>
    %cst_8 = arith.constant -1.000000e+30 : f32
    %43 = vector.shape_cast %42 : vector<1x16x16xi1> to vector<1x16x16xi1>
    %44 = vector.broadcast %43 : vector<1x16x16xi1> to vector<4x16x16xi1>
    %45 = vector.broadcast %cst_8 : f32 to vector<4x16x16xf32>
    %46 = arith.select %44, %38, %45 : vector<4x16x16xi1>, vector<4x16x16xf32>
    %cst_9 = arith.constant dense<0xFF800000> : vector<4x16xf32>
    %47 = vector.multi_reduction <maximumf>, %46, %cst_9 [2] : vector<4x16x16xf32> to vector<4x16xf32>
    %48 = vector.shape_cast %47 : vector<4x16xf32> to vector<4x16x1xf32>
    %49 = vector.broadcast %48 : vector<4x16x1xf32> to vector<4x16x16xf32>
    %50 = arith.subf %46, %49 : vector<4x16x16xf32>
    %51 = math.exp %50 : vector<4x16x16xf32>
    %cst_10 = arith.constant dense<0.000000e+00> : vector<4x16xf32>
    %52 = vector.multi_reduction <add>, %51, %cst_10 [2] : vector<4x16x16xf32> to vector<4x16xf32>
    %53 = vector.shape_cast %52 : vector<4x16xf32> to vector<4x16x1xf32>
    %54 = tpu.reciprocal %53 {approx = true} : vector<4x16x1xf32> -> vector<4x16x1xf32>
    %55 = vector.broadcast %54 : vector<4x16x1xf32> to vector<4x16x16xf32>
    %56 = arith.mulf %51, %55 : vector<4x16x16xf32>
    %57 = arith.truncf %56 : vector<4x16x16xf32> to vector<4x16x16xbf16>
    %cst_11 = arith.constant dense<0.000000e+00> : vector<4x16x32xf32>
    %58 = tpu.matmul %57, %35, %cst_11 {dimension_numbers = #tpu.dot_dimension_numbers<[2], [1], [1], [2], [0, 0, 0, 1, 1, 2], [0], [0]>} : vector<4x16x16xbf16>, vector<4x16x32xbf16>, vector<4x16x32xf32> -> vector<4x16x32xf32>
    %59 = vector.extract_strided_slice %58 {offsets = [0, 0, 0], sizes = [1, 16, 32], strides = [1, 1, 1]} : vector<4x16x32xf32> to vector<1x16x32xf32>
    %60 = vector.shape_cast %59 : vector<1x16x32xf32> to vector<16x32xf32>
    %61 = vector.extract_strided_slice %58 {offsets = [1, 0, 0], sizes = [1, 16, 32], strides = [1, 1, 1]} : vector<4x16x32xf32> to vector<1x16x32xf32>
    %62 = vector.shape_cast %61 : vector<1x16x32xf32> to vector<16x32xf32>
    %63 = vector.extract_strided_slice %58 {offsets = [2, 0, 0], sizes = [1, 16, 32], strides = [1, 1, 1]} : vector<4x16x32xf32> to vector<1x16x32xf32>
    %64 = vector.shape_cast %63 : vector<1x16x32xf32> to vector<16x32xf32>
    %65 = vector.extract_strided_slice %58 {offsets = [3, 0, 0], sizes = [1, 16, 32], strides = [1, 1, 1]} : vector<4x16x32xf32> to vector<1x16x32xf32>
    %66 = vector.shape_cast %65 : vector<1x16x32xf32> to vector<16x32xf32>
    %67 = tpu.concatenate %60, %62, %64, %66 in 1 : vector<16x32xf32>, vector<16x32xf32>, vector<16x32xf32>, vector<16x32xf32> -> vector<16x128xf32>
    %68 = arith.truncf %67 : vector<16x128xf32> to vector<16x128xbf16>
    %c0_12 = arith.constant 0 : index
    %c0_13 = arith.constant 0 : index
    %69 = vector.load %arg4[%c0_12, %c0_13] : memref<128x128xbf16, #tpu.memory_space<vmem>>, vector<128x128xbf16>
    %cst_14 = arith.constant dense<0.000000e+00> : vector<16x128xf32>
    %70 = tpu.matmul %68, %69, %cst_14 {dimension_numbers = #tpu.dot_dimension_numbers<[1], [1], [0], [0], [0, 0, 1, 0], [], []>} : vector<16x128xbf16>, vector<128x128xbf16>, vector<16x128xf32> -> vector<16x128xf32>
    %c0_15 = arith.constant 0 : index
    %c0_16 = arith.constant 0 : index
    %71 = vector.load %arg5[%c0_15, %c0_16] : memref<1x128xf32, #tpu.memory_space<vmem>>, vector<1x128xf32>
    %72 = vector.broadcast %71 : vector<1x128xf32> to vector<16x128xf32>
    %73 = arith.addf %70, %72 : vector<16x128xf32>
    %74 = arith.addf %2, %73 : vector<16x128xf32>
    %cst_17 = arith.constant dense<0.000000e+00> : vector<16xf32>
    %75 = vector.multi_reduction <add>, %74, %cst_17 [1] : vector<16x128xf32> to vector<16xf32>
    %76 = vector.shape_cast %75 : vector<16xf32> to vector<16x1xf32>
    %cst_18 = arith.constant 1.280000e+02 : f32
    %77 = vector.broadcast %cst_18 : f32 to vector<16x1xf32>
    %78 = arith.divf %76, %77 : vector<16x1xf32>
    %79 = vector.broadcast %78 : vector<16x1xf32> to vector<16x128xf32>
    %80 = arith.subf %74, %79 : vector<16x128xf32>
    %81 = arith.mulf %80, %80 : vector<16x128xf32>
    %cst_19 = arith.constant dense<0.000000e+00> : vector<16xf32>
    %82 = vector.multi_reduction <add>, %81, %cst_19 [1] : vector<16x128xf32> to vector<16xf32>
    %83 = vector.shape_cast %82 : vector<16xf32> to vector<16x1xf32>
    %cst_20 = arith.constant 1.280000e+02 : f32
    %84 = vector.broadcast %cst_20 : f32 to vector<16x1xf32>
    %85 = arith.divf %83, %84 : vector<16x1xf32>
    %86 = vector.broadcast %78 : vector<16x1xf32> to vector<16x128xf32>
    %87 = arith.subf %74, %86 : vector<16x128xf32>
    %cst_21 = arith.constant 9.99999974E-6 : f32
    %88 = vector.broadcast %cst_21 : f32 to vector<16x1xf32>
    %89 = arith.addf %85, %88 : vector<16x1xf32>
    %90 = math.rsqrt %89 : vector<16x1xf32>
    %91 = vector.broadcast %90 : vector<16x1xf32> to vector<16x128xf32>
    %92 = arith.mulf %87, %91 : vector<16x128xf32>
    %c0_22 = arith.constant 0 : index
    %c0_23 = arith.constant 0 : index
    %93 = vector.load %arg6[%c0_22, %c0_23] : memref<1x128xf32, #tpu.memory_space<vmem>>, vector<1x128xf32>
    %94 = vector.broadcast %93 : vector<1x128xf32> to vector<16x128xf32>
    %95 = arith.mulf %92, %94 : vector<16x128xf32>
    %c0_24 = arith.constant 0 : index
    %c0_25 = arith.constant 0 : index
    %96 = vector.load %arg7[%c0_24, %c0_25] : memref<1x128xf32, #tpu.memory_space<vmem>>, vector<1x128xf32>
    %97 = vector.broadcast %96 : vector<1x128xf32> to vector<16x128xf32>
    %98 = arith.addf %95, %97 : vector<16x128xf32>
    %99 = arith.truncf %98 : vector<16x128xf32> to vector<16x128xbf16>
    %c0_26 = arith.constant 0 : index
    %c0_27 = arith.constant 0 : index
    %100 = vector.load %arg8[%c0_26, %c0_27] : memref<256x128xbf16, #tpu.memory_space<vmem>>, vector<256x128xbf16>
    %cst_28 = arith.constant dense<0.000000e+00> : vector<16x256xf32>
    %101 = tpu.matmul %99, %100, %cst_28 {dimension_numbers = #tpu.dot_dimension_numbers<[1], [1], [0], [0], [0, 0, 1, 0], [], []>} : vector<16x128xbf16>, vector<256x128xbf16>, vector<16x256xf32> -> vector<16x256xf32>
    %c0_29 = arith.constant 0 : index
    %c0_30 = arith.constant 0 : index
    %102 = vector.load %arg9[%c0_29, %c0_30] : memref<1x256xf32, #tpu.memory_space<vmem>>, vector<1x256xf32>
    %103 = vector.broadcast %102 : vector<1x256xf32> to vector<16x256xf32>
    %104 = arith.addf %101, %103 : vector<16x256xf32>
    %cst_31 = arith.constant 0.000000e+00 : f32
    %105 = vector.broadcast %cst_31 : f32 to vector<16x256xf32>
    %106 = arith.maximumf %104, %105 : vector<16x256xf32>
    %107 = arith.truncf %106 : vector<16x256xf32> to vector<16x256xbf16>
    %c0_32 = arith.constant 0 : index
    %c0_33 = arith.constant 0 : index
    %108 = vector.load %arg10[%c0_32, %c0_33] : memref<128x256xbf16, #tpu.memory_space<vmem>>, vector<128x256xbf16>
    %cst_34 = arith.constant dense<0.000000e+00> : vector<16x128xf32>
    %109 = tpu.matmul %107, %108, %cst_34 {dimension_numbers = #tpu.dot_dimension_numbers<[1], [1], [0], [0], [0, 0, 1, 0], [], []>} : vector<16x256xbf16>, vector<128x256xbf16>, vector<16x128xf32> -> vector<16x128xf32>
    %c0_35 = arith.constant 0 : index
    %c0_36 = arith.constant 0 : index
    %110 = vector.load %arg11[%c0_35, %c0_36] : memref<1x128xf32, #tpu.memory_space<vmem>>, vector<1x128xf32>
    %111 = vector.broadcast %110 : vector<1x128xf32> to vector<16x128xf32>
    %112 = arith.addf %109, %111 : vector<16x128xf32>
    %113 = arith.addf %98, %112 : vector<16x128xf32>
    %cst_37 = arith.constant dense<0.000000e+00> : vector<16xf32>
    %114 = vector.multi_reduction <add>, %113, %cst_37 [1] : vector<16x128xf32> to vector<16xf32>
    %115 = vector.shape_cast %114 : vector<16xf32> to vector<16x1xf32>
    %cst_38 = arith.constant 1.280000e+02 : f32
    %116 = vector.broadcast %cst_38 : f32 to vector<16x1xf32>
    %117 = arith.divf %115, %116 : vector<16x1xf32>
    %118 = vector.broadcast %117 : vector<16x1xf32> to vector<16x128xf32>
    %119 = arith.subf %113, %118 : vector<16x128xf32>
    %120 = arith.mulf %119, %119 : vector<16x128xf32>
    %cst_39 = arith.constant dense<0.000000e+00> : vector<16xf32>
    %121 = vector.multi_reduction <add>, %120, %cst_39 [1] : vector<16x128xf32> to vector<16xf32>
    %122 = vector.shape_cast %121 : vector<16xf32> to vector<16x1xf32>
    %cst_40 = arith.constant 1.280000e+02 : f32
    %123 = vector.broadcast %cst_40 : f32 to vector<16x1xf32>
    %124 = arith.divf %122, %123 : vector<16x1xf32>
    %125 = vector.broadcast %117 : vector<16x1xf32> to vector<16x128xf32>
    %126 = arith.subf %113, %125 : vector<16x128xf32>
    %cst_41 = arith.constant 9.99999974E-6 : f32
    %127 = vector.broadcast %cst_41 : f32 to vector<16x1xf32>
    %128 = arith.addf %124, %127 : vector<16x1xf32>
    %129 = math.rsqrt %128 : vector<16x1xf32>
    %130 = vector.broadcast %129 : vector<16x1xf32> to vector<16x128xf32>
    %131 = arith.mulf %126, %130 : vector<16x128xf32>
    %c0_42 = arith.constant 0 : index
    %c0_43 = arith.constant 0 : index
    %132 = vector.load %arg12[%c0_42, %c0_43] : memref<1x128xf32, #tpu.memory_space<vmem>>, vector<1x128xf32>
    %133 = vector.broadcast %132 : vector<1x128xf32> to vector<16x128xf32>
    %134 = arith.mulf %131, %133 : vector<16x128xf32>
    %c0_44 = arith.constant 0 : index
    %c0_45 = arith.constant 0 : index
    %135 = vector.load %arg13[%c0_44, %c0_45] : memref<1x128xf32, #tpu.memory_space<vmem>>, vector<1x128xf32>
    %136 = vector.broadcast %135 : vector<1x128xf32> to vector<16x128xf32>
    %137 = arith.addf %134, %136 : vector<16x128xf32>
    %138 = arith.truncf %137 : vector<16x128xf32> to vector<16x128xbf16>
    %c0_46 = arith.constant 0 : index
    %c0_47 = arith.constant 0 : index
    %c0_48 = arith.constant 0 : index
    %139 = vector.load %arg14[%c0_46, %c0_47, %c0_48] : memref<1x16x128xbf16, #tpu.memory_space<vmem>>, vector<1x16x128xbf16>
    %140 = vector.shape_cast %139 : vector<1x16x128xbf16> to vector<16x128xbf16>
    %141 = vector.shape_cast %138 : vector<16x128xbf16> to vector<1x16x128xbf16>
    tpu.vector_store %arg14[%c0_46, %c0_47, %c0_48], %141 {strides = array<i32>} : memref<1x16x128xbf16, #tpu.memory_space<vmem>>, vector<1x16x128xbf16>,
    return
  }
  func.func @transform_0(%arg0: i32) -> (i32, i32, i32) {
    %c0_i32 = arith.constant 0 : i32
    %c0_i32_0 = arith.constant 0 : i32
    %c0_i32_1 = arith.constant 0 : i32
    return %arg0, %c0_i32, %c0_i32_0 : i32, i32, i32
  }
  func.func @transform_1(%arg0: i32) -> (i32, i32) {
    %c0_i32 = arith.constant 0 : i32
    %c0_i32_0 = arith.constant 0 : i32
    %c0_i32_1 = arith.constant 0 : i32
    return %c0_i32, %c0_i32_0 : i32, i32
  }
  func.func @transform_2(%arg0: i32) -> (i32, i32) {
    %c0_i32 = arith.constant 0 : i32
    %c0_i32_0 = arith.constant 0 : i32
    %c0_i32_1 = arith.constant 0 : i32
    return %c0_i32, %c0_i32_0 : i32, i32
  }
  func.func @transform_3(%arg0: i32) -> (i32, i32) {
    %c0_i32 = arith.constant 0 : i32
    %c0_i32_0 = arith.constant 0 : i32
    %c0_i32_1 = arith.constant 0 : i32
    return %c0_i32, %c0_i32_0 : i32, i32
  }
  func.func @transform_4(%arg0: i32) -> (i32, i32) {
    %c0_i32 = arith.constant 0 : i32
    %c0_i32_0 = arith.constant 0 : i32
    %c0_i32_1 = arith.constant 0 : i32
    return %c0_i32, %c0_i32_0 : i32, i32
  }
  func.func @transform_5(%arg0: i32) -> (i32, i32) {
    %c0_i32 = arith.constant 0 : i32
    %c0_i32_0 = arith.constant 0 : i32
    %c0_i32_1 = arith.constant 0 : i32
    return %c0_i32, %c0_i32_0 : i32, i32
  }
  func.func @transform_6(%arg0: i32) -> (i32, i32) {
    %c0_i32 = arith.constant 0 : i32
    %c0_i32_0 = arith.constant 0 : i32
    %c0_i32_1 = arith.constant 0 : i32
    return %c0_i32, %c0_i32_0 : i32, i32
  }
  func.func @transform_7(%arg0: i32) -> (i32, i32) {
    %c0_i32 = arith.constant 0 : i32
    %c0_i32_0 = arith.constant 0 : i32
    %c0_i32_1 = arith.constant 0 : i32
    return %c0_i32, %c0_i32_0 : i32, i32
  }
  func.func @transform_8(%arg0: i32) -> (i32, i32) {
    %c0_i32 = arith.constant 0 : i32
    %c0_i32_0 = arith.constant 0 : i32
    %c0_i32_1 = arith.constant 0 : i32
    return %c0_i32, %c0_i32_0 : i32, i32
  }
  func.func @transform_9(%arg0: i32) -> (i32, i32) {
    %c0_i32 = arith.constant 0 : i32
    %c0_i32_0 = arith.constant 0 : i32
    %c0_i32_1 = arith.constant 0 : i32
    return %c0_i32, %c0_i32_0 : i32, i32
  }
  func.func @transform_10(%arg0: i32) -> (i32, i32) {
    %c0_i32 = arith.constant 0 : i32
    %c0_i32_0 = arith.constant 0 : i32
    %c0_i32_1 = arith.constant 0 : i32
    return %c0_i32, %c0_i32_0 : i32, i32
  }
  func.func @transform_11(%arg0: i32) -> (i32, i32) {
    %c0_i32 = arith.constant 0 : i32
    %c0_i32_0 = arith.constant 0 : i32
    %c0_i32_1 = arith.constant 0 : i32
    return %c0_i32, %c0_i32_0 : i32, i32
  }
  func.func @transform_12(%arg0: i32) -> (i32, i32) {
    %c0_i32 = arith.constant 0 : i32
    %c0_i32_0 = arith.constant 0 : i32
    %c0_i32_1 = arith.constant 0 : i32
    return %c0_i32, %c0_i32_0 : i32, i32
  }
  func.func @transform_13(%arg0: i32) -> (i32, i32, i32) {
    %c0_i32 = arith.constant 0 : i32
    %c0_i32_0 = arith.constant 0 : i32
    %c0_i32_1 = arith.constant 0 : i32
    return %arg0, %c0_i32, %c0_i32_0 : i32, i32, i32
  }
}

module attributes {stable_mosaic.version = 11 : i64} {
  func.func @_decoder_kernel(%arg0: i32, %arg1: i32, %arg2: memref<32x128xbf16, #tpu.memory_space<vmem>>, %arg3: memref<128x128xbf16, #tpu.memory_space<vmem>>, %arg4: memref<1x128xf32, #tpu.memory_space<vmem>>, %arg5: memref<32x128xf32, #tpu.memory_space<vmem>>) attributes {dimension_semantics = [#tpu.dimension_semantics<parallel>, #tpu.dimension_semantics<parallel>], iteration_bounds = array<i64: 1, 1>, scalar_prefetch = 0 : i64, scratch_operands = 0 : i64, tpu.core_type = #tpu.core_type<tc>, window_params = [{transform_indices = @transform_0, window_bounds = array<i64: 32, 128>}, {transform_indices = @transform_1, window_bounds = array<i64: 128, 128>}, {transform_indices = @transform_2, window_bounds = array<i64: 1, 128>}, {transform_indices = @transform_3, window_bounds = array<i64: 32, 128>}]} {
    %c0 = arith.constant 0 : index
    %c0_0 = arith.constant 0 : index
    %0 = vector.load %arg2[%c0, %c0_0] : memref<32x128xbf16, #tpu.memory_space<vmem>>, vector<32x128xbf16>
    %c0_1 = arith.constant 0 : index
    %c0_2 = arith.constant 0 : index
    %1 = vector.load %arg3[%c0_1, %c0_2] : memref<128x128xbf16, #tpu.memory_space<vmem>>, vector<128x128xbf16>
    %cst = arith.constant dense<0.000000e+00> : vector<32x128xf32>
    %2 = tpu.matmul %0, %1, %cst {dimension_numbers = #tpu.dot_dimension_numbers<[1], [1], [0], [0], [0, 0, 1, 0], [], []>} : vector<32x128xbf16>, vector<128x128xbf16>, vector<32x128xf32> -> vector<32x128xf32>
    %c0_3 = arith.constant 0 : index
    %c0_4 = arith.constant 0 : index
    %3 = vector.load %arg4[%c0_3, %c0_4] : memref<1x128xf32, #tpu.memory_space<vmem>>, vector<1x128xf32>
    %4 = vector.broadcast %3 : vector<1x128xf32> to vector<32x128xf32>
    %5 = arith.addf %2, %4 : vector<32x128xf32>
    %c0_5 = arith.constant 0 : index
    %c0_6 = arith.constant 0 : index
    %6 = vector.load %arg5[%c0_5, %c0_6] : memref<32x128xf32, #tpu.memory_space<vmem>>, vector<32x128xf32>
    tpu.vector_store %arg5[%c0_5, %c0_6], %5 {strides = array<i32>} : memref<32x128xf32, #tpu.memory_space<vmem>>, vector<32x128xf32>,
    return
  }
  func.func @transform_0(%arg0: i32, %arg1: i32) -> (i32, i32) {
    %c0_i32 = arith.constant 0 : i32
    %c0_i32_0 = arith.constant 0 : i32
    return %arg0, %c0_i32 : i32, i32
  }
  func.func @transform_1(%arg0: i32, %arg1: i32) -> (i32, i32) {
    %c0_i32 = arith.constant 0 : i32
    %c0_i32_0 = arith.constant 0 : i32
    return %arg1, %c0_i32 : i32, i32
  }
  func.func @transform_2(%arg0: i32, %arg1: i32) -> (i32, i32) {
    %c0_i32 = arith.constant 0 : i32
    %c0_i32_0 = arith.constant 0 : i32
    return %c0_i32, %arg1 : i32, i32
  }
  func.func @transform_3(%arg0: i32, %arg1: i32) -> (i32, i32) {
    %c0_i32 = arith.constant 0 : i32
    return %arg0, %arg1 : i32, i32
  }
}

</mosaic_0001>

<bundles_post_ra>
// kernel: model_forward.4
= control target key start
LH: loop header
LB: loop body
LE: loop exit
PB: predicated region body
PF: predicated region fallthrough
CT: control target
= control target key end

     0   :  { %s608_s0 = inlined_call_operand.vmem [shape: s32[32], index: 0, kind: input, shape index: {}]   ;;  %s609_s1 = inlined_call_operand.hbm [shape: f32[128,128], index: 1, kind: input, shape index: {}]   ;;  %s610_s2 = inlined_call_operand.hbm [shape: f32[512,128], index: 2, kind: input, shape index: {}]   ;;  %s611_s3 = inlined_call_operand.vmem [shape: bf16[2,16,128], index: 3, kind: output, shape index: {}]  }
   0x1   :  { %s8_s14 = sshll.u32 %s608_s0, 4  ;;  %s9_s14 = int_to_ptr.vmem [resolvable:$true] %s8_s14 }
   0x2   :  { %s428_s15 = scalar_lea.vmem %s9_s14, 16  ;;  %p433_p1 = scmp.lt.s32.totalorder %s9_s14, %s9_s14 }
   0x3   :  { %p429_p0 = scmp.ne.s32.totalorder %s9_s14, %s428_s15  ;;  %p434_p2 = scmp.lt.s32.totalorder %s428_s15, %s428_s15 }
   0x5   :  { %p435_p3 = por %p434_p2, %p433_p1 }
   0x7   :  { %p436_p4 = pnand %p435_p3, %p429_p0 }
   0x9   :  { %439 = shalt.err (!%p436_p4)  }
   0xa   :  { %s520_s16 = smov [#allocation5]  }
   0xb   :  { %11 = dma.vmem_to_smem %s9_s14, 16, %s520_s16, [#allocation4] }
   0xc   :  { %500 = dma.done.wait [#allocation4], 16 }
   0xd   :  { %501 = vsyncadd [#allocation4], 4294967280 }
   0xe   :  { %13 = sfence }
   0xf   :  { %14 = vsyncpa [#allocation7], 0  ;;  %s548_s17 = smov 0  }
  0x10 LB: > { %s554_s0 = sadd.s32 4294967295, %s510_s17   ;;  %p354_p5 = scmp.ge.s32.totalorder %s510_s17, 1  ;;  %s510_s17 = sphi %s548_s17, %s20_s17  }
  0x11   : > { %p72_p6 = scmp.lt.s32.totalorder %s510_s17, 3  ;;  %s521_s18 = smov [#allocation6]  }
  0x12   : > { %s84_s19 = sshll.u32 %s521_s18, 4  ;;  %p398_p8 = scmp.eq.s32.totalorder %s554_s0, 0  ;;  %s85_s19 = int_to_ptr.vmem [resolvable:$true] %s84_s19 }
  0x13   : > { %p558_p7 = pnand %p354_p5, %p72_p6  ;;  %s451_s21 = scalar_lea.vmem %s85_s19, 256 }
  0x14   : > { %p452_p12 = scmp.ne.s32.totalorder %s85_s19, %s451_s21  ;;  %p459_p1 = scmp.lt.s32.totalorder %s85_s19, %s85_s19 }
  0x15   : > { %p394_p9 = pneg %p558_p7  ;;  %p460_p2 = scmp.lt.s32.totalorder %s451_s21, %s451_s21 }
  0x17   : > { %p395_p10 = pnand %p398_p8, %p394_p9  ;;  %p461_p3 = por %p460_p2, %p459_p1 }
  0x19   : > { %p442_p11 = pneg %p395_p10 }
  0x1b   : > { %p454_p13 = pnand %p452_p12, %p442_p11 }
  0x1d   : > { %p455_p0 = pneg %p454_p13 }
  0x1f   : > { %p462_p4 = pnand %p461_p3, %p455_p0 }
  0x21   : > { %465 = shalt.err (!%p462_p4)
}
  0x22   : > { %s522_s22 = smov 128   ;;  %s523_s23 = smov 8  }
  0x23   : > { %397 = dma.hbm_to_vmem [thread:$0]  (!%p395_p10), %s610_s2, 256, %s85_s19, [#allocation7], %s522_s22, %s522_s22, %s523_s23  }
  0x24   : > { %100 = sbr.rel (%p558_p7) target bundleno = 97 (0x61), region = 24 }
  0x29   : > { %503 = dma.done.wait (%p398_p8), [#allocation7], 256  }
  0x2a   : > { %505 = vsyncadd (%p398_p8), [#allocation7], 4294967040  ;;  %p115_p5 = scmp.lt.s32.totalorder %s554_s0, 1  ;;  %s583_s4 = smov 0  }
  0x2c   : > { %s116_s26 = scalar_select %p115_p5, %s554_s0, 1 }
  0x2e   : > { %s382_s27 = sshll.u32 %s116_s26, 3 }
  0x2f   : > { %s581_s30 = scalar_lea.vmem %s611_s3, %s382_s27 }
  0x30 LB: >> { %s360_s5 = sshll.u32 %s514_s4, 1  ;;  %s131_s8 = scalar_lea.vmem [#allocation2], %s514_s4  ;;  %s514_s4 = sphi %s583_s4, %s125_s4  }
  0x31   : >> { %s127_s6 = sadd.s32 %s360_s5, %s554_s0  ;;  %s140_s9 = sshll.u32 %s131_s8, 4  ;;  %s141_s9 = int_to_ptr.vmem [resolvable:$true] %s140_s9 }
  0x32   : >> { %s128_s7 = sld [smem:[#allocation5 + %s127_s6]]  ;;  %s132_s14 = scalar_lea.sflag [#allocation3], %s514_s4 }
  0x33   : >> { %s468_s19 = scalar_lea.hbm %s609_s1, 2048 }
  0x38   : >> { %s361_s10 = sshll.u32 %s128_s7, 4 }
  0x39   : >> { %s130_s13 = scalar_lea.hbm %s609_s1, %s361_s10 }
  0x3a   : >> { %s466_s15 = scalar_lea.hbm %s130_s13, 16  ;;  %p469_p7 = scmp.lt.s32.totalorder %s130_s13, %s609_s1 }
  0x3b   : >> { %p467_p6 = scmp.ne.s32.totalorder %s130_s13, %s466_s15  ;;  %p470_p8 = scmp.lt.s32.totalorder %s468_s19, %s466_s15 }
  0x3d   : >> { %p471_p9 = por %p470_p8, %p469_p7 }
  0x3f   : >> { %p472_p10 = pnand %p471_p9, %p467_p6 }
  0x41   : >> { %475 = shalt.err (!%p472_p10)  }
  0x42   : >> { %s476_s22 = scalar_lea.vmem %s141_s9, 16  ;;  %s524_s23 = smov [#allocation2]  }
  0x43   : >> { %p477_p11 = scmp.ne.s32.totalorder %s141_s9, %s476_s22  ;;  %s478_s24 = sshll.u32 %s524_s23, 4  ;;  %s479_s24 = int_to_ptr.vmem [resolvable:$false] %s478_s24 }
  0x44   : >> { %s480_s25 = scalar_lea.vmem %s479_s24, 256  ;;  %p481_p12 = scmp.lt.s32.totalorder %s141_s9, %s479_s24 }
  0x45   : >> { %p482_p13 = scmp.lt.s32.totalorder %s480_s25, %s476_s22 }
  0x47   : >> { %p483_p0 = por %p482_p13, %p481_p12 }
  0x49   : >> { %p484_p1 = pnand %p483_p0, %p477_p11 }
  0x4b   : >> { %487 = shalt.err (!%p484_p1)  }
  0x4c   : >> { %143 = dma.hbm_to_vmem [thread:$0]  %s130_s13, 16, %s141_s9, %s132_s14 }
  0x4d   : >> { %s125_s4 = sadd.s32 1, %s514_s4  }
  0x4e   : >> { %p122_p2 = scmp.ge.s32.totalorder %s125_s4, 16  }
  0x4f   : > { %s516_s26 = smov (%p122_p2), 0  }
  0x50   : > { %124 = sbr.rel (!%p122_p2) target bundleno = 48 (0x30), region = 93 }
  0x55 LB: >> { %s150_s27 = scalar_lea.sflag [#allocation3], %s518_s26  ;;  %s518_s26 = sphi %s516_s26, %s149_s26  }
  0x56   : >> { %506 = dma.done.wait %s150_s27, 16 }
  0x57   : >> { %507 = vsyncadd %s150_s27, 4294967280  ;;  %s149_s26 = sadd.s32 1, %s518_s26  }
  0x58   : >> { %p146_p3 = scmp.ge.s32.totalorder %s149_s26, 16  }
  0x59   : > { %v153_v0 = vld [vmem:[#allocation2] sm:$0xff] (%p146_p3)  ;;  %v154_v1 = vld [vmem:[#allocation2 + $0x8] sm:$0xff] (%p146_p3)  ;;  %v157_v2 = vld [vmem:[#allocation6] sm:$0xff] (%p146_p3) }
  0x5a   : > { %148 = sbr.rel (!%p146_p3) target bundleno = 85 (0x55), region = 104  ;;  %v155_v3 = vmul.f32 (%p146_p3), 11.313708, %v153_v0  ;;  %v156_v4 = vmul.f32 (%p146_p3), 11.313708, %v154_v1  ;;  %v158_v5 = vld [vmem:[#allocation6 + $0x8] sm:$0xff] (%p146_p3) }
  0x5c   : > { %v159_v6 = vadd.f32 (%p146_p3), %v157_v2, %v155_v3  ;;  %v160_v7 = vadd.f32 (%p146_p3), %v158_v5, %v156_v4 }
  0x5e   : > { %v388_v8 = vpack.c.bf16 (%p146_p3), %v160_v7, %v159_v6 }
  0x60   : > { %389 = vst [vmem:[%s581_s30] sm:$0xff] %v388_v8  }
  0x61 PF: > { %s20_s17 = sadd.s32 1, %s510_s17  }
  0x62   : > { %p17_p4 = scmp.ge.s32.totalorder %s20_s17, 4  }
  0x64   :  { %19 = sbr.rel (!%p17_p4) target bundleno = 16 (0x10), region = 115 }
  0x69   :  { %192 = vsyncpa [#allocation7], 1 }
  0x6a   :  { %194 = vsyncpa [#allocation7 + $0x1], 1 }
  0x6b   :  { %195 = vsyncmov [#allocation3] }
  0x6e   :  { %s196_s0 = vpop.sfrf %195 }
  0x6f   :  { %p366_p5 = scmp.ne.s32.totalorder %s196_s0, 0 }
  0x71   :  { %200 = shalt.err (%p366_p5)  }
  0x72   :  { %202 = vsyncmov [#allocation3 + $0x1] }
  0x75   :  { %s203_s28 = vpop.sfrf %202 }
  0x76   :  { %p367_p6 = scmp.ne.s32.totalorder %s203_s28, 0 }
  0x78   :  { %207 = shalt.err (%p367_p6)  }
  0x79   :  { %209 = vsyncmov [#allocation3 + $0x2] }
  0x7c   :  { %s210_s29 = vpop.sfrf %209 }
  0x7d   :  { %p368_p7 = scmp.ne.s32.totalorder %s210_s29, 0 }
  0x7f   :  { %214 = shalt.err (%p368_p7)  }
  0x80   :  { %216 = vsyncmov [#allocation3 + $0x3] }
  0x83   :  { %s217_s30 = vpop.sfrf %216 }
  0x84   :  { %p369_p8 = scmp.ne.s32.totalorder %s217_s30, 0 }
  0x86   :  { %221 = shalt.err (%p369_p8)  }
  0x87   :  { %223 = vsyncmov [#allocation3 + $0x4] }
  0x8a   :  { %s224_s17 = vpop.sfrf %223 }
  0x8b   :  { %p370_p9 = scmp.ne.s32.totalorder %s224_s17, 0 }
  0x8d   :  { %228 = shalt.err (%p370_p9)  }
  0x8e   :  { %230 = vsyncmov [#allocation3 + $0x5] }
  0x91   :  { %s231_s1 = vpop.sfrf %230 }
  0x92   :  { %p371_p10 = scmp.ne.s32.totalorder %s231_s1, 0 }
  0x94   :  { %235 = shalt.err (%p371_p10)  }
  0x95   :  { %237 = vsyncmov [#allocation3 + $0x6] }
  0x98   :  { %s238_s2 = vpop.sfrf %237 }
  0x99   :  { %p372_p11 = scmp.ne.s32.totalorder %s238_s2, 0 }
  0x9b   :  { %242 = shalt.err (%p372_p11)  }
  0x9c   :  { %244 = vsyncmov [#allocation3 + $0x7] }
  0x9f   :  { %s245_s3 = vpop.sfrf %244 }
  0xa0   :  { %p373_p12 = scmp.ne.s32.totalorder %s245_s3, 0 }
  0xa2   :  { %249 = shalt.err (%p373_p12)  }
  0xa3   :  { %251 = vsyncmov [#allocation3 + $0x8] }
  0xa6   :  { %s252_s4 = vpop.sfrf %251 }
  0xa7   :  { %p374_p13 = scmp.ne.s32.totalorder %s252_s4, 0 }
  0xa9   :  { %256 = shalt.err (%p374_p13)  }
  0xaa   :  { %258 = vsyncmov [#allocation3 + $0x9] }
  0xad   :  { %s259_s5 = vpop.sfrf %258 }
  0xae   :  { %p375_p0 = scmp.ne.s32.totalorder %s259_s5, 0 }
  0xb0   :  { %263 = shalt.err (%p375_p0)  }
  0xb1   :  { %265 = vsyncmov [#allocation3 + $0xa] }
  0xb4   :  { %s266_s6 = vpop.sfrf %265 }
  0xb5   :  { %p376_p1 = scmp.ne.s32.totalorder %s266_s6, 0 }
  0xb7   :  { %270 = shalt.err (%p376_p1)  }
  0xb8   :  { %272 = vsyncmov [#allocation3 + $0xb] }
  0xbb   :  { %s273_s7 = vpop.sfrf %272 }
  0xbc   :  { %p377_p2 = scmp.ne.s32.totalorder %s273_s7, 0 }
  0xbe   :  { %277 = shalt.err (%p377_p2)  }
  0xbf   :  { %279 = vsyncmov [#allocation3 + $0xc] }
  0xc2   :  { %s280_s8 = vpop.sfrf %279 }
  0xc3   :  { %p378_p3 = scmp.ne.s32.totalorder %s280_s8, 0 }
  0xc5   :  { %284 = shalt.err (%p378_p3)  }
  0xc6   :  { %286 = vsyncmov [#allocation3 + $0xd] }
  0xc9   :  { %s287_s9 = vpop.sfrf %286 }
  0xca   :  { %p379_p4 = scmp.ne.s32.totalorder %s287_s9, 0 }
  0xcc   :  { %291 = shalt.err (%p379_p4)  }
  0xcd   :  { %293 = vsyncmov [#allocation3 + $0xe] }
  0xd0   :  { %s294_s10 = vpop.sfrf %293 }
  0xd1   :  { %p380_p5 = scmp.ne.s32.totalorder %s294_s10, 0 }
  0xd3   :  { %298 = shalt.err (%p380_p5)  }
  0xd4   :  { %300 = vsyncmov [#allocation3 + $0xf] }
  0xd7   :  { %s301_s11 = vpop.sfrf %300 }
  0xd8   :  { %p381_p6 = scmp.ne.s32.totalorder %s301_s11, 0 }
  0xda   :  { %305 = shalt.err (%p381_p6)  }

// kernel: model_forward.7
= control target key start
LH: loop header
LB: loop body
LE: loop exit
PB: predicated region body
PF: predicated region fallthrough
CT: control target
= control target key end

     0   :  { %s307_s0 = inlined_call_operand.vmem [shape: bf16[32,128], index: 0, kind: input, shape index: {}]   ;;  %s308_s1 = inlined_call_operand.vmem [shape: bf16[128,128], index: 1, kind: input, shape index: {}]   ;;  %s309_s2 = inlined_call_operand.vmem [shape: f32[1,128], index: 2, kind: input, shape index: {}]   ;;  %s310_s3 = inlined_call_operand.hbm [shape: f32[32,128], index: 3, kind: output, shape index: {}]  }
   0x1   :  { %v216_v0 = vld [vmem:[%s308_s1 + $0x38] sm:$0xff]   ;;  %v217_v1 = vld [vmem:[%s308_s1 + $0x30] sm:$0xff]   ;;  %v218_v2 = vld [vmem:[%s308_s1 + $0x28] sm:$0xff]  }
   0x2   :  { %193 = vmatprep.subr.bf16.mxu0 %v216_v0  ;;  %v224_v3 = vld [vmem:[%s307_s0] sm:$0xff]  }
   0x3   :  { %194 = vmatpush3.bf16.xpose.msra.mxu0 %v216_v0  ;;  %209 = vmatprep.mubr.bf16.mxu0 %v224_v3 }
   0x4   :  { %195 = vmatprep.subr.bf16.mxu0 %v217_v1 }
   0x5   :  { %8 = vsyncpa [#allocation3], 0  ;;  %v219_v4 = vld [vmem:[%s308_s1 + $0x20] sm:$0xff]   ;;  %v220_v5 = vld [vmem:[%s308_s1 + $0x18] sm:$0xff]   ;;  %s248_s7 = smov [#allocation2]  }
   0x6   :  { %v221_v6 = vld [vmem:[%s308_s1 + $0x10] sm:$0xff]   ;;  %v222_v7 = vld [vmem:[%s308_s1 + $0x8] sm:$0xff]   ;;  %v223_v8 = vld [vmem:[%s308_s1] sm:$0xff]   ;;  %s161_s8 = sshll.u32 %s248_s7, 4  ;;  %s162_s8 = int_to_ptr.vmem [resolvable:$true] %s161_s8 }
   0x7   :  { %v225_v9 = vld [vmem:[%s307_s0 + $0x8] sm:$0xff]   ;;  %v172_v10 = vld [vmem:[%s309_s2] ss:$0 sm:$0xff]  ;;  %s226_s0 = scalar_lea.vmem %s162_s8, 512  ;;  %p231_p1 = scmp.lt.s32.totalorder %s162_s8, %s162_s8 }
   0x8   :  { %p227_p0 = scmp.ne.s32.totalorder %s162_s8, %s226_s0  ;;  %p232_p2 = scmp.lt.s32.totalorder %s226_s0, %s226_s0 }
   0xa   :  { %p233_p3 = por %p232_p2, %p231_p1 }
   0xb   :  { %196 = vmatpush3.bf16.xpose.msra.mxu0 %v217_v1 }
   0xc   :  { %197 = vmatprep.subr.bf16.mxu0 %v218_v2  ;;  %p234_p4 = pnand %p233_p3, %p227_p0 }
  0x13   :  { %198 = vmatpush3.bf16.xpose.msra.mxu0 %v218_v2 }
  0x14   :  { %199 = vmatprep.subr.bf16.mxu0 %v219_v4 }
  0x1b   :  { %200 = vmatpush3.bf16.xpose.msra.mxu0 %v219_v4 }
  0x1c   :  { %201 = vmatprep.subr.bf16.mxu0 %v220_v5 }
  0x23   :  { %202 = vmatpush3.bf16.xpose.msra.mxu0 %v220_v5 }
  0x24   :  { %203 = vmatprep.subr.bf16.mxu0 %v221_v6 }
  0x2b   :  { %204 = vmatpush3.bf16.xpose.msra.mxu0 %v221_v6 }
  0x2c   :  { %205 = vmatprep.subr.bf16.mxu0 %v222_v7 }
  0x33   :  { %206 = vmatpush3.bf16.xpose.msra.mxu0 %v222_v7 }
  0x34   :  { %207 = vmatprep.subr.bf16.mxu0 %v223_v8 }
  0x3b   :  { %208 = vmatpush3.bf16.xpose.msra.mxu0 %v223_v8 }
  0x42   :  { %210 = vmatmul.mubr.bf16.vlgmr.msra.gmra.mxu0 %v225_v9 }
 0x102   :  { %v211_v11 = vpop.f32.mrf.mxu0 }
 0x103   :  { %v146_v12 = vadd.f32 %v211_v11, %v172_v10 }
 0x104   :  { %v137_v13 = vpop.f32.mrf.mxu0 }
 0x105   :  { %154 = vst [vmem:[#allocation2 + $0x10] sm:$0xff] %v146_v12  ;;  %v138_v14 = vadd.f32 %v172_v10, %v137_v13 }
 0x106   :  { %v212_v15 = vpop.f32.mrf.mxu0 }
 0x107   :  { %152 = vst [vmem:[#allocation2] sm:$0xff] %v138_v14  ;;  %v149_v16 = vadd.f32 %v212_v15, %v172_v10 }
 0x108   :  { %v140_v17 = vpop.f32.mrf.mxu0 }
 0x109   :  { %155 = vst [vmem:[#allocation2 + $0x18] sm:$0xff] %v149_v16  ;;  %v141_v18 = vadd.f32 %v172_v10, %v140_v17 }
 0x10b   :  { %153 = vst [vmem:[#allocation2 + $0x8] sm:$0xff] %v141_v18 }
 0x10c   :  { %237 = shalt.err (!%p234_p4)
}
 0x10d   :  { %s249_s1 = smov 128   ;;  %s250_s2 = smov 8  }
 0x10e   :  { %167 = dma.vmem_to_hbm [thread:$0]  %s162_s8, 512, %s310_s3, [#allocation3], %s249_s1, %s249_s1, %s250_s2  }
 0x10f   :  { %246 = dma.done.wait [#allocation3], 512  }
 0x110   :  { %247 = vsyncadd [#allocation3], 4294966784 }
 0x111   :  { %171 = vsyncpa [#allocation3], 1 }

// kernel: model_forward.5
= control target key start
LH: loop header
LB: loop body
LE: loop exit
PB: predicated region body
PF: predicated region fallthrough
CT: control target
= control target key end

     0   :  { %s2370_s25 = smov 0   ;;  %s2738_s0 = inlined_call_operand.vmem [shape: bf16[2,16,128], index: 0, kind: input, shape index: {}]   ;;  %s2739_s1 = inlined_call_operand.vmem [shape: bf16[384,128], index: 1, kind: input, shape index: {}]   ;;  %s2740_s2 = inlined_call_operand.vmem [shape: f32[1,384], index: 2, kind: input, shape index: {}]   ;;  %s2741_s3 = inlined_call_operand.vmem [shape: bf16[128,128], index: 3, kind: input, shape index: {}]   ;;  %s2742_s4 = inlined_call_operand.vmem [shape: f32[1,128], index: 4, kind: input, shape index: {}]   ;;  %s2743_s5 = inlined_call_operand.vmem [shape: f32[1,128], index: 5, kind: input, shape index: {}]   ;;  %s2744_s6 = inlined_call_operand.vmem [shape: f32[1,128], index: 6, kind: input, shape index: {}]   ;;  %s2745_s7 = inlined_call_operand.vmem [shape: bf16[256,128], index: 7, kind: input, shape index: {}]   ;;  %s2746_s8 = inlined_call_operand.vmem [shape: f32[1,256], index: 8, kind: input, shape index: {}]   ;;  %s2747_s9 = inlined_call_operand.vmem [shape: bf16[128,256], index: 9, kind: input, shape index: {}]   ;;  %s2748_s10 = inlined_call_operand.vmem [shape: f32[1,128], index: 10, kind: input, shape index: {}]   ;;  %s2749_s11 = inlined_call_operand.vmem [shape: f32[1,128], index: 11, kind: input, shape index: {}]   ;;  %s2750_s12 = inlined_call_operand.vmem [shape: f32[1,128], index: 12, kind: input, shape index: {}]   ;;  %s2751_s13 = inlined_call_operand.vmem [shape: bf16[2,16,128], index: 13, kind: output, shape index: {}]  }
   0x1 LB: > { %s1886_s26 = sadd.s32 4294967295, %s2293_s25   ;;  %p1890_p0 = scmp.ge.s32.totalorder %s2293_s25, 1  ;;  %s2293_s25 = sphi %s2370_s25, %s23_s25  }
   0x2   : > { %p387_p1 = scmp.lt.s32.totalorder %s2293_s25, 3 }
   0x4   : > { %p388_p2 = pnand %p1890_p0, %p387_p1 }
   0x5   : > { %p431_p3 = scmp.lt.s32.totalorder (!%p388_p2), %s1886_s26, 1  ;;  %s2297_s22 = smov (!%p388_p2), 64  }
   0x6   : > { %391 = sbr.rel (%p388_p2) target bundleno = 2477 (0x9ad), region = 72  ;;  %s2299_s24 = smov (!%p388_p2), 32  }
   0xb   : > { %v2173_v0 = vld [vmem:[%s2739_s1 + $0x78] sm:$0xff]   ;;  %v2175_v2 = vld [vmem:[%s2739_s1 + $0x70] sm:$0xff]   ;;  %v2295_v3 = vmov 0.0   ;;  %s2753_s26 = smov (!%p431_p3, %s1886_s26), 1  ;;  %v2177_v5 = vld [vmem:[%s2739_s1 + $0x68] sm:$0xff]   ;;  %vm2296_vm0 = vmmov 0   ;;  %v496_v26 = vlaneseq }
   0xc   : > { %v2174_v1 = vld [vmem:[%s2739_s1 + $0x38] sm:$0xff]   ;;  %1987 = vmatprep.subr.bf16.mxu0 %v2173_v0  ;;  %2057 = vmatprep.subr.bf16.mxu1 %v2295_v3  ;;  %v2176_v4 = vld [vmem:[%s2739_s1 + $0x30] sm:$0xff]   ;;  %s1978_s20 = sshll.u32 %s2753_s26, 3  ;;  %v2178_v6 = vld [vmem:[%s2739_s1 + $0x28] sm:$0xff]   ;;  %vm772_vm1 = vcmask 261120   ;;  %vm988_vm3 = vcmask 130048  }
   0xd   : > { %1988 = vmatpush3.bf16.xpose.msra.mxu0 %v2174_v1  ;;  %s435_s23 = scalar_lea.vmem %s2738_s0, %s1978_s20  ;;  %v2179_v7 = vld [vmem:[%s2739_s1 + $0x60] sm:$0xff]   ;;  %v2190_v9 = vld [vmem:[%s2739_s1 + $0xb8] sm:$0xff]   ;;  %v2191_v12 = vld [vmem:[%s2739_s1 + $0xb0] sm:$0xff]   ;;  %2073 = vmatprep.mubr.msk.bf16.mxu1 %vm2296_vm0, %v2295_v3  ;;  %v2480_v27 = vshrl.u32 %v496_v26, 7  ;;  %v973_v62 = vand.u32 127, %v496_v26  ;;  %vm1283_vm5 = vcmask 523264   ;;  %s440_s28 = scalar_lea.vmem %s2751_s13, %s1978_s20 }
   0xe   : > { %1989 = vmatprep.subr.bf16.mxu0 %v2175_v2  ;;  %v2408_v8 = vld [vmem:[%s435_s23] sm:$0xff]   ;;  %2058 = vmatpush3.bf16.xpose.msra.mxu1 %v2190_v9  ;;  %v2181_v11 = vld [vmem:[%s2739_s1 + $0x58] sm:$0xff]   ;;  %v2183_v14 = vld [vmem:[%s2739_s1 + $0x50] sm:$0xff]   ;;  %s2298_s23 = smov 96   ;;  %vm1286_vm6 = vcmask 785408  }
   0xf   : > { %2003 = vmatprep.mubr.bf16.mxu0 %v2408_v8  ;;  %2059 = vmatprep.subr.bf16.mxu1 %v2295_v3  ;;  %v2180_v10 = vld [vmem:[%s2739_s1 + $0x20] sm:$0xff]   ;;  %v2182_v13 = vld [vmem:[%s2739_s1 + $0x18] sm:$0xff]   ;;  %v2192_v15 = vld [vmem:[%s2739_s1 + $0xa8] sm:$0xff]   ;;  %v502_v28 = vsub.s32 1, %v2480_v27  ;;  %v498_v32 = vsub.s32 0, %v2480_v27  ;;  %v506_v44 = vsub.s32 2, %v2480_v27  ;;  %vm974_vm2 = vcmp.le.s32.totalorder %v973_v62, %v2480_v27 }
  0x10   : > { %v2184_v16 = vld [vmem:[%s2739_s1 + $0x10] sm:$0xff]   ;;  %v2185_v17 = vld [vmem:[%s2739_s1 + $0x48] sm:$0xff]   ;;  %v2193_v18 = vld [vmem:[%s2739_s1 + $0xa0] sm:$0xff]   ;;  %v971_v0 = vadd.s32 8, %v2480_v27 }
  0x11   : > { %v2186_v19 = vld [vmem:[%s2739_s1 + $0x8] sm:$0xff]   ;;  %v2187_v20 = vld [vmem:[%s2739_s1 + $0x40] sm:$0xff]   ;;  %v2194_v21 = vld [vmem:[%s2739_s1 + $0x98] sm:$0xff]  }
  0x12   : > { %v2188_v22 = vld [vmem:[%s2739_s1] sm:$0xff]   ;;  %v2195_v23 = vld [vmem:[%s2739_s1 + $0x90] sm:$0xff]   ;;  %v2196_v24 = vld [vmem:[%s2739_s1 + $0x88] sm:$0xff]   ;;  %vm975_vm4 = vcmp.le.s32.totalorder %v973_v62, %v971_v0 }
  0x13   : > { %v2197_v25 = vld [vmem:[%s2739_s1 + $0x80] sm:$0xff]  }
  0x14   : > { %v494_v30 = vld [vmem:[%s2740_s2] sm:$0x7] }
  0x15   : > { %1990 = vmatpush3.bf16.xpose.msra.mxu0 %v2176_v4  ;;  %v503_v33 = vrot.slane %v494_v30, %v502_v28  ;;  %v499_v36 = vrot.slane %v494_v30, %v498_v32  ;;  %v507_v45 = vrot.slane %v494_v30, %v506_v44  ;;  %v1955_v27 = vld [vmem:[%s2748_s10] ss:$0 sm:$0xff] }
  0x16   : > { %1991 = vmatprep.subr.bf16.mxu0 %v2177_v5  ;;  %2060 = vmatpush3.bf16.xpose.msra.mxu1 %v2191_v12 }
  0x17   : > { %2061 = vmatprep.subr.bf16.mxu1 %v2295_v3 }
  0x1d   : > { %1992 = vmatpush3.bf16.xpose.msra.mxu0 %v2178_v6 }
  0x1e   : > { %1993 = vmatprep.subr.bf16.mxu0 %v2179_v7  ;;  %2062 = vmatpush3.bf16.xpose.msra.mxu1 %v2192_v15 }
  0x1f   : > { %2063 = vmatprep.subr.bf16.mxu1 %v2295_v3 }
  0x25   : > { %1994 = vmatpush3.bf16.xpose.msra.mxu0 %v2180_v10 }
  0x26   : > { %1995 = vmatprep.subr.bf16.mxu0 %v2181_v11  ;;  %2064 = vmatpush3.bf16.xpose.msra.mxu1 %v2193_v18 }
  0x27   : > { %2065 = vmatprep.subr.bf16.mxu1 %v2295_v3 }
  0x2d   : > { %1996 = vmatpush3.bf16.xpose.msra.mxu0 %v2182_v13 }
  0x2e   : > { %1997 = vmatprep.subr.bf16.mxu0 %v2183_v14  ;;  %2066 = vmatpush3.bf16.xpose.msra.mxu1 %v2194_v21 }
  0x2f   : > { %2067 = vmatprep.subr.bf16.mxu1 %v2295_v3 }
  0x35   : > { %1998 = vmatpush3.bf16.xpose.msra.mxu0 %v2184_v16 }
  0x36   : > { %1999 = vmatprep.subr.bf16.mxu0 %v2185_v17  ;;  %2068 = vmatpush3.bf16.xpose.msra.mxu1 %v2195_v23 }
  0x37   : > { %2069 = vmatprep.subr.bf16.mxu1 %v2295_v3 }
  0x3d   : > { %2000 = vmatpush3.bf16.xpose.msra.mxu0 %v2186_v19 }
  0x3e   : > { %2001 = vmatprep.subr.bf16.mxu0 %v2187_v20  ;;  %2070 = vmatpush3.bf16.xpose.msra.mxu1 %v2196_v24 }
  0x3f   : > { %2071 = vmatprep.subr.bf16.mxu1 %v2295_v3 }
  0x45   : > { %2002 = vmatpush3.bf16.xpose.msra.mxu0 %v2188_v22 }
  0x46   : > { %2125 = vmatprep.subr.bf16.mxu0 %v2295_v3  ;;  %2072 = vmatpush3.bf16.xpose.msra.mxu1 %v2197_v25 }
  0x47   : > { %2077 = vmatprep.subr.bf16.mxu1 %v2295_v3 }
  0x4c   : > { %2004 = vmatmul.mubr.bf16.vlgmr.msra.gmra.mxu0 %v2408_v8 }
  0x4d   : > { %2141 = vmatprep.mubr.msk.bf16.mxu0 %vm2296_vm0, %v2295_v3  ;;  %2074 = vmatmul.mubr.bf16.vlgmr.msra.gmra.mxu1 %v2408_v8 }
  0x4e   : > { %2079 = vmatprep.mubr.msk.bf16.mxu1 %vm2296_vm0, %v2295_v3 }
 0x10c   : > { %v695_v29 = vpop.f32.mrf.mxu0 }
 0x10d   : > { %v696_v41 = vadd.f32 %v695_v29, %v499_v36  ;;  %v738_v46 = vpop.f32.mrf.mxu1 }
 0x10e   : > { %v697_v31 = vpop.f32.mrf.mxu0  ;;  %v739_v48 = vadd.f32 %v738_v46, %v507_v45 }
 0x10f   : > { %v698_v37 = vadd.f32 %v697_v31, %v503_v33  ;;  %v2075_v47 = vpop.f32.mrf.mxu1 }
 0x110   : > { %v699_v34 = vpop.f32.mrf.mxu0 }
 0x111   : > { %v700_v39 = vadd.f32 %v699_v34, %v499_v36  ;;  %v741_v49 = vpop.f32.mrf.mxu1 }
 0x112   : > { %v701_v35 = vpop.f32.mrf.mxu0  ;;  %v742_v50 = vadd.f32 %v741_v49, %v507_v45 }
 0x113   : > { %v702_v38 = vadd.f32 %v701_v35, %v503_v33  ;;  %v745_v43 = vpack.c.bf16 %v700_v39, %v696_v41  ;;  %v2076_v51 = vpop.f32.mrf.mxu1 }
 0x114   : > { %v2503_v52 = vpack.c.bf16 %v742_v50, %v739_v48 }
 0x115   : > { %v746_v40 = vpack.c.bf16 %v702_v38, %v698_v37 }
 0x117   : > { %758 = vrot.lane.b32.xlu1 %v746_v40, %s2297_s22  ;;  %756 = vrot.lane.b32.xlu0 %v746_v40, %s2298_s23  ;;  %v777_v42 = vsel %vm772_vm1, %v746_v40, 0 }
 0x118   : > { %2078 = vmatpush3.bf16.xpose.msra.mxu1 %v777_v42 }
 0x119   : > { %2083 = vmatprep.subr.bf16.mxu1 %v2295_v3 }
 0x11b   : > { %751 = vrot.lane.b32.xlu1 %v745_v43, %s2297_s22  ;;  %749 = vrot.lane.b32.xlu0 %v745_v43, %s2298_s23 }
 0x11f   : > { %753 = vrot.lane.b32.xlu1 %v745_v43, %s2299_s24  ;;  %760 = vrot.lane.b32.xlu0 %v746_v40, %s2299_s24 }
 0x120   : > { %2080 = vmatmul.mubr.msk.bf16.vlgmr.msra.gmra.mxu1 %vm772_vm1, %v745_v43 }
 0x121   : > { %2085 = vmatprep.mubr.msk.bf16.mxu1 %vm2296_vm0, %v2295_v3 }
 0x189   : > { %v757_v53 = vpop.permute.xlu0 %756  ;;  %v759_v55 = vpop.permute.xlu1 %758 }
 0x18a   : > { %v824_v54 = vsel %vm772_vm1, %v757_v53, 0  ;;  %v871_v57 = vsel %vm772_vm1, %v759_v55, 0 }
 0x18b   : > { %2084 = vmatpush3.bf16.xpose.msra.mxu1 %v824_v54 }
 0x18c   : > { %2089 = vmatprep.subr.bf16.mxu1 %v2295_v3 }
 0x18d   : > { %v750_v56 = vpop.permute.xlu0 %749  ;;  %v752_v59 = vpop.permute.xlu1 %751 }
 0x191   : > { %v761_v58 = vpop.permute.xlu0 %760  ;;  %v754_v61 = vpop.permute.xlu1 %753 }
 0x192   : > { %2086 = vmatmul.mubr.msk.bf16.vlgmr.msra.gmra.mxu1 %vm772_vm1, %v750_v56  ;;  %v918_v60 = vsel %vm772_vm1, %v761_v58, 0 }
 0x193   : > { %2090 = vmatpush3.bf16.xpose.msra.mxu1 %v871_v57  ;;  %2091 = vmatprep.mubr.msk.bf16.mxu1 %vm2296_vm0, %v2295_v3 }
 0x194   : > { %2095 = vmatprep.subr.bf16.mxu1 %v2295_v3 }
 0x19a   : > { %2092 = vmatmul.mubr.msk.bf16.vlgmr.msra.gmra.mxu1 %vm772_vm1, %v752_v59 }
 0x19b   : > { %2096 = vmatpush3.bf16.xpose.msra.mxu1 %v918_v60  ;;  %2097 = vmatprep.mubr.msk.bf16.mxu1 %vm2296_vm0, %v2295_v3 }
 0x19c   : > { %2101 = vmatprep.subr.bf16.mxu1 %v2295_v3 }
 0x1a2   : > { %2098 = vmatmul.mubr.msk.bf16.vlgmr.msra.gmra.mxu1 %vm772_vm1, %v754_v61 }
 0x1a3   : > { %2102 = vmatpush3.bf16.msra.mxu1 %v2503_v52  ;;  %2103 = vmatprep.mubr.msk.bf16.mxu1 %vm2296_vm0, %v2295_v3 }
 0x1a4   : > { %2107 = vmatprep.subr.bf16.mxu1 %v2295_v3 }
 0x1e0   : > { %v813_v63 = vpop.f32.mrf.mxu1 }
 0x1e1   : > { %v961_v1 = vmul.f32 0.17677669, %v813_v63 }
 0x1e2   : > { %v2081_v2 = vpop.f32.mrf.mxu1 }
 0x1e3   : > { %v980_v4 = vsel %vm974_vm2, %v961_v1, -1e+30 }
 0x1e4   : > { %v816_v5 = vpop.f32.mrf.mxu1  ;;  %v989_v6 = vsel %vm988_vm3, %v980_v4, -inf }
 0x1e5   : > { %v962_v7 = vmul.f32 0.17677669, %v816_v5  ;;  %990 = vmax.xlane.f32.xlu0 %v989_v6 }
 0x1e6   : > { %v2082_v9 = vpop.f32.mrf.mxu1 }
 0x1e7   : > { %v981_v10 = vsel %vm975_vm4, %v962_v7, -1e+30 }
 0x1e8   : > { %v992_v11 = vsel %vm988_vm3, %v981_v10, -inf }
 0x1e9   : > { %993 = vmax.xlane.f32.xlu1 %v992_v11 }
 0x252   : > { %v860_v12 = vpop.f32.mrf.mxu1 }
 0x253   : > { %v963_v13 = vmul.f32 0.17677669, %v860_v12 }
 0x254   : > { %v2087_v14 = vpop.f32.mrf.mxu1 }
 0x255   : > { %v982_v15 = vsel %vm974_vm2, %v963_v13, -1e+30 }
 0x256   : > { %v863_v16 = vpop.f32.mrf.mxu1  ;;  %v995_v17 = vsel %vm988_vm3, %v982_v15, -inf }
 0x257   : > { %v964_v18 = vmul.f32 0.17677669, %v863_v16  ;;  %996 = vmax.xlane.f32.xlu0 %v995_v17 }
 0x258   : > { %v2088_v19 = vpop.f32.mrf.mxu1 }
 0x259   : > { %v983_v20 = vsel %vm975_vm4, %v964_v18, -1e+30 }
 0x25a   : > { %v907_v21 = vpop.f32.mrf.mxu1  ;;  %v998_v22 = vsel %vm988_vm3, %v983_v20, -inf }
 0x25b   : > { %v965_v23 = vmul.f32 0.17677669, %v907_v21  ;;  %999 = vmax.xlane.f32.xlu0 %v998_v22 }
 0x25c   : > { %v2093_v24 = vpop.f32.mrf.mxu1 }
 0x25d   : > { %v984_v25 = vsel %vm974_vm2, %v965_v23, -1e+30 }
 0x25e   : > { %v910_v26 = vpop.f32.mrf.mxu1  ;;  %v1001_v29 = vsel %vm988_vm3, %v984_v25, -inf }
 0x25f   : > { %v966_v30 = vmul.f32 0.17677669, %v910_v26  ;;  %1002 = vmax.xlane.f32.xlu1 %v1001_v29 }
 0x260   : > { %v2094_v31 = vpop.f32.mrf.mxu1 }
 0x261   : > { %v985_v33 = vsel %vm975_vm4, %v966_v30, -1e+30 }
 0x262   : > { %v954_v34 = vpop.f32.mrf.mxu1  ;;  %v1004_v35 = vsel %vm988_vm3, %v985_v33, -inf }
 0x263   : > { %v967_v36 = vmul.f32 0.17677669, %v954_v34  ;;  %1005 = vmax.xlane.f32.xlu0 %v1004_v35 }
 0x264   : > { %v2099_v37 = vpop.f32.mrf.mxu1 }
 0x265   : > { %v986_v38 = vsel %vm974_vm2, %v967_v36, -1e+30 }
 0x266   : > { %v957_v39 = vpop.f32.mrf.mxu1  ;;  %v1007_v40 = vsel %vm988_vm3, %v986_v38, -inf }
 0x267   : > { %v968_v41 = vmul.f32 0.17677669, %v957_v39  ;;  %1008 = vmax.xlane.f32.xlu1 %v1007_v40 }
 0x268   : > { %v2100_v42 = vpop.f32.mrf.mxu1 }
 0x269   : > { %v987_v43 = vsel %vm975_vm4, %v968_v41, -1e+30 }
 0x26a   : > { %v1010_v44 = vsel %vm988_vm3, %v987_v43, -inf }
 0x26b   : > { %1011 = vmax.xlane.f32.xlu0 %v1010_v44 }
 0x26e   : > { %v991_v45 = vpop.xlane.xlu0 %990 }
 0x26f   : > { %v1013_v46 = vsub.f32 %v980_v4, %v991_v45 }
 0x271   : > { %v1021_v47 = vmul.f32 1.442695, %v1013_v46 }
 0x272   : > { %v994_v48 = vpop.xlane.xlu1 %993 }
 0x273   : > { %2247 = vpow2.f32 %v1021_v47  ;;  %v1014_v49 = vsub.f32 %v981_v10, %v994_v48 }
 0x275   : > { %v1023_v50 = vmul.f32 1.442695, %v1014_v49 }
 0x277   : > { %2249 = vpow2.f32 %v1023_v50 }
 0x280   : > { %v2248_v51 = vpop.eup %2247 }
 0x281   : > { %v1037_v53 = vsel %vm988_vm3, %v2248_v51, 0.0 }
 0x282   : > { %1038 = vadd.xlane.f32.xlu1 %v1037_v53 }
 0x284   : > { %v2250_v54 = vpop.eup %2249 }
 0x285   : > { %v1040_v55 = vsel %vm988_vm3, %v2250_v54, 0.0 }
 0x286   : > { %1041 = vadd.xlane.f32.xlu0 %v1040_v55 }
 0x293   : > { %763 = vrot.lane.b32.xlu1 %v2503_v52, %s2298_s23 }
 0x2e0   : > { %v997_v56 = vpop.xlane.xlu0 %996 }
 0x2e1   : > { %v1015_v57 = vsub.f32 %v982_v15, %v997_v56 }
 0x2e3   : > { %v1025_v58 = vmul.f32 1.442695, %v1015_v57 }
 0x2e4   : > { %v1000_v59 = vpop.xlane.xlu0 %999 }
 0x2e5   : > { %2251 = vpow2.f32 %v1025_v58  ;;  %v1016_v60 = vsub.f32 %v983_v20, %v1000_v59 }
 0x2e7   : > { %v1027_v61 = vmul.f32 1.442695, %v1016_v60 }
 0x2e8   : > { %v1003_v62 = vpop.xlane.xlu1 %1002 }
 0x2e9   : > { %2253 = vpow2.f32 %v1027_v61  ;;  %v1017_v63 = vsub.f32 %v984_v25, %v1003_v62  ;;  %v2198_v62 = vld [vmem:[%s2741_s3 + $0x38] sm:$0xff]  }
 0x2ea   : > { %2126 = vmatpush3.bf16.xpose.msra.mxu0 %v2198_v62 }
 0x2eb   : > { %v1029_v0 = vmul.f32 1.442695, %v1017_v63  ;;  %2127 = vmatprep.subr.bf16.mxu0 %v2295_v3  ;;  %v2199_v63 = vld [vmem:[%s2741_s3 + $0x30] sm:$0xff]  }
 0x2ec   : > { %v1006_v1 = vpop.xlane.xlu0 %1005 }
 0x2ed   : > { %2255 = vpow2.f32 %v1029_v0  ;;  %v1018_v2 = vsub.f32 %v985_v33, %v1006_v1  ;;  %v2200_v0 = vld [vmem:[%s2741_s3 + $0x28] sm:$0xff]   ;;  %v2201_v1 = vld [vmem:[%s2741_s3 + $0x20] sm:$0xff]  }
 0x2ef   : > { %v1031_v4 = vmul.f32 1.442695, %v1018_v2  ;;  %v2202_v2 = vld [vmem:[%s2741_s3 + $0x18] sm:$0xff]  }
 0x2f0   : > { %v1009_v5 = vpop.xlane.xlu1 %1008 }
 0x2f1   : > { %2257 = vpow2.f32 %v1031_v4  ;;  %v1019_v6 = vsub.f32 %v986_v38, %v1009_v5  ;;  %v2203_v4 = vld [vmem:[%s2741_s3 + $0x10] sm:$0xff]   ;;  %v2204_v5 = vld [vmem:[%s2741_s3 + $0x8] sm:$0xff]  }
 0x2f2   : > { %v2252_v7 = vpop.eup %2251  ;;  %2128 = vmatpush3.bf16.xpose.msra.mxu0 %v2199_v63 }
 0x2f3   : > { %v1033_v9 = vmul.f32 1.442695, %v1019_v6  ;;  %v1043_v10 = vsel %vm988_vm3, %v2252_v7, 0.0  ;;  %2129 = vmatprep.subr.bf16.mxu0 %v2295_v3 }
 0x2f4   : > { %1044 = vadd.xlane.f32.xlu1 %v1043_v10  ;;  %v1012_v11 = vpop.xlane.xlu0 %1011  ;;  %v2205_v10 = vld [vmem:[%s2741_s3] sm:$0xff]  }
 0x2f5   : > { %2259 = vpow2.f32 %v1033_v9  ;;  %v1020_v12 = vsub.f32 %v987_v43, %v1012_v11 }
 0x2f6   : > { %v2254_v13 = vpop.eup %2253 }
 0x2f7   : > { %v1035_v14 = vmul.f32 1.442695, %v1020_v12  ;;  %v1046_v15 = vsel %vm988_vm3, %v2254_v13, 0.0 }
 0x2f8   : > { %1047 = vadd.xlane.f32.xlu0 %v1046_v15 }
 0x2f9   : > { %2261 = vpow2.f32 %v1035_v14 }
 0x2fa   : > { %v2256_v16 = vpop.eup %2255  ;;  %2130 = vmatpush3.bf16.xpose.msra.mxu0 %v2200_v0 }
 0x2fb   : > { %v1049_v17 = vsel %vm988_vm3, %v2256_v16, 0.0  ;;  %2131 = vmatprep.subr.bf16.mxu0 %v2295_v3 }
 0x2fc   : > { %1050 = vadd.xlane.f32.xlu1 %v1049_v17 }
 0x2fe   : > { %v2258_v18 = vpop.eup %2257 }
 0x2ff   : > { %v1052_v19 = vsel %vm988_vm3, %v2258_v18, 0.0 }
 0x300   : > { %1053 = vadd.xlane.f32.xlu0 %v1052_v19 }
 0x302   : > { %v2260_v20 = vpop.eup %2259  ;;  %2132 = vmatpush3.bf16.xpose.msra.mxu0 %v2201_v1 }
 0x303   : > { %v1055_v21 = vsel %vm988_vm3, %v2260_v20, 0.0  ;;  %2133 = vmatprep.subr.bf16.mxu0 %v2295_v3 }
 0x304   : > { %1056 = vadd.xlane.f32.xlu1 %v1055_v21 }
 0x306   : > { %v2262_v22 = vpop.eup %2261 }
 0x307   : > { %v1058_v23 = vsel %vm988_vm3, %v2262_v22, 0.0 }
 0x308   : > { %1059 = vadd.xlane.f32.xlu0 %v1058_v23 }
 0x30a   : > { %2134 = vmatpush3.bf16.xpose.msra.mxu0 %v2202_v2 }
 0x30b   : > { %v1039_v24 = vpop.xlane.xlu1 %1038  ;;  %2135 = vmatprep.subr.bf16.mxu0 %v2295_v3 }
 0x30c   : > { %2263 = vrcp.f32 %v1039_v24 }
 0x30f   : > { %v1042_v25 = vpop.xlane.xlu0 %1041  ;;  %v764_v34 = vpop.permute.xlu1 %763 }
 0x310   : > { %2265 = vrcp.f32 %v1042_v25 }
 0x312   : > { %2136 = vmatpush3.bf16.xpose.msra.mxu0 %v2203_v4 }
 0x313   : > { %2137 = vmatprep.subr.bf16.mxu0 %v2295_v3 }
 0x315   : > { %769 = vrot.lane.b32.xlu1 %v2503_v52, %s2299_s24 }
 0x319   : > { %v2264_v26 = vpop.eup %2263 }
 0x31a   : > { %v1069_v30 = vmul.f32 %v2264_v26, %v2248_v51  ;;  %2138 = vmatpush3.bf16.xpose.msra.mxu0 %v2204_v5  ;;  %v2215_v5 = vld [vmem:[%s2745_s7 + $0x18] sm:$0xff]  }
 0x31b   : > { %2139 = vmatprep.subr.bf16.mxu0 %v2295_v3 }
 0x31d   : > { %v2266_v29 = vpop.eup %2265 }
 0x31e   : > { %766 = vrot.lane.b32.xlu0 %v2503_v52, %s2297_s22  ;;  %v1070_v31 = vmul.f32 %v2266_v29, %v2250_v54 }
 0x320   : > { %v1077_v33 = vpack.c.bf16 %v1070_v31, %v1069_v30 }
 0x322   : > { %2104 = vmatmul.mubr.msk.bf16.vlgmr.msra.gmra.mxu1 %vm988_vm3, %v1077_v33  ;;  %2140 = vmatpush3.bf16.xpose.msra.mxu0 %v2205_v10  ;;  %v2219_v10 = vld [vmem:[%s2745_s7 + $0x8] sm:$0xff]  }
 0x323   : > { %2108 = vmatpush3.bf16.msra.mxu1 %v764_v34  ;;  %2109 = vmatprep.mubr.msk.bf16.mxu1 %vm2296_vm0, %v2295_v3 }
 0x324   : > { %2113 = vmatprep.subr.bf16.mxu1 %v2295_v3 }
 0x37d   : > { %v1045_v35 = vpop.xlane.xlu1 %1044 }
 0x37e   : > { %2267 = vrcp.f32 %v1045_v35 }
 0x381   : > { %v1048_v36 = vpop.xlane.xlu0 %1047 }
 0x382   : > { %2269 = vrcp.f32 %v1048_v36 }
 0x385   : > { %v1051_v37 = vpop.xlane.xlu1 %1050 }
 0x386   : > { %2271 = vrcp.f32 %v1051_v37 }
 0x389   : > { %v1054_v38 = vpop.xlane.xlu0 %1053 }
 0x38a   : > { %2273 = vrcp.f32 %v1054_v38 }
 0x38b   : > { %v2268_v52 = vpop.eup %2267 }
 0x38c   : > { %v1071_v41 = vmul.f32 %v2268_v52, %v2252_v7 }
 0x38d   : > { %v1057_v39 = vpop.xlane.xlu1 %1056 }
 0x38e   : > { %2275 = vrcp.f32 %v1057_v39 }
 0x38f   : > { %v2270_v40 = vpop.eup %2269 }
 0x390   : > { %v1072_v42 = vmul.f32 %v2270_v40, %v2254_v13  ;;  %v1928_v40 = vld [vmem:[%s2742_s4] ss:$0 sm:$0xff] }
 0x391   : > { %v1060_v43 = vpop.xlane.xlu0 %1059  ;;  %v770_v51 = vpop.permute.xlu1 %769 }
 0x392   : > { %2277 = vrcp.f32 %v1060_v43  ;;  %v1078_v44 = vpack.c.bf16 %v1072_v42, %v1071_v41  ;;  %v444_v41 = vunpack.c.l.bf16 %v2408_v8 }
 0x393   : > { %v2272_v45 = vpop.eup %2271 }
 0x394   : > { %2110 = vmatmul.mubr.msk.bf16.vlgmr.msra.gmra.mxu1 %vm988_vm3, %v1078_v44  ;;  %v1073_v48 = vmul.f32 %v2272_v45, %v2256_v16 }
 0x395   : > { %v767_v46 = vpop.permute.xlu0 %766  ;;  %2115 = vmatprep.mubr.msk.bf16.mxu1 %vm2296_vm0, %v2295_v3 }
 0x396   : > { %2114 = vmatpush3.bf16.msra.mxu1 %v767_v46  ;;  %v445_v46 = vunpack.c.h.bf16 %v2408_v8  ;;  %v2209_v8 = vld [vmem:[%s2745_s7 + $0x30] sm:$0xff]  }
 0x397   : > { %v2274_v47 = vpop.eup %2273  ;;  %2119 = vmatprep.subr.bf16.mxu1 %v2295_v3 }
 0x398   : > { %v1074_v49 = vmul.f32 %v2274_v47, %v2258_v18 }
 0x39a   : > { %v1079_v50 = vpack.c.bf16 %v1074_v49, %v1073_v48 }
 0x39b   : > { %v2276_v53 = vpop.eup %2275 }
 0x39c   : > { %2116 = vmatmul.mubr.msk.bf16.vlgmr.msra.gmra.mxu1 %vm988_vm3, %v1079_v50  ;;  %v1075_v55 = vmul.f32 %v2276_v53, %v2260_v20  ;;  %v2207_v53 = vld [vmem:[%s2745_s7 + $0x38] sm:$0xff]  }
 0x39d   : > { %2120 = vmatpush3.bf16.msra.mxu1 %v770_v51  ;;  %2121 = vmatprep.mubr.msk.bf16.mxu1 %vm2296_vm0, %v2295_v3  ;;  %v2206_v51 = vld [vmem:[%s2745_s7 + $0x78] sm:$0xff]  }
 0x39e   : > { %2039 = vmatprep.subr.bf16.mxu1 %v2206_v51 }
 0x39f   : > { %v2278_v54 = vpop.eup %2277 }
 0x3a0   : > { %v1076_v56 = vmul.f32 %v2278_v54, %v2262_v22  ;;  %v2208_v54 = vld [vmem:[%s2745_s7 + $0x70] sm:$0xff]  }
 0x3a2   : > { %v1080_v57 = vpack.c.bf16 %v1076_v56, %v1075_v55  ;;  %v2210_v55 = vld [vmem:[%s2745_s7 + $0x68] sm:$0xff]  }
 0x3a3   : > { %v2211_v56 = vld [vmem:[%s2745_s7 + $0x28] sm:$0xff]  }
 0x3a4   : > { %2122 = vmatmul.mubr.msk.bf16.vlgmr.msra.gmra.mxu1 %vm988_vm3, %v1080_v57  ;;  %v2212_v57 = vld [vmem:[%s2745_s7 + $0x60] sm:$0xff]  }
 0x3a5   : > { %2040 = vmatpush3.bf16.xpose.msra.mxu1 %v2207_v53 }
 0x3a6   : > { %2041 = vmatprep.subr.bf16.mxu1 %v2208_v54 }
 0x3ad   : > { %2042 = vmatpush3.bf16.xpose.msra.mxu1 %v2209_v8 }
 0x3ae   : > { %2043 = vmatprep.subr.bf16.mxu1 %v2210_v55 }
 0x3b5   : > { %2044 = vmatpush3.bf16.xpose.msra.mxu1 %v2211_v56 }
 0x3b6   : > { %2045 = vmatprep.subr.bf16.mxu1 %v2212_v57 }
 0x3e2   : > { %v1118_v58 = vpop.f32.mrf.mxu1 }
 0x3e4   : > { %v2105_v59 = vpop.f32.mrf.mxu1 }
 0x3e5   : > { %v2214_v59 = vld [vmem:[%s2745_s7 + $0x58] sm:$0xff]  }
 0x3e6   : > { %v1121_v60 = vpop.f32.mrf.mxu1 }
 0x3e8   : > { %v2106_v61 = vpop.f32.mrf.mxu1 }
 0x454   : > { %v1162_v6 = vpop.f32.mrf.mxu1 }
 0x456   : > { %v2111_v7 = vpop.f32.mrf.mxu1 }
 0x457   : > { %v2217_v7 = vld [vmem:[%s2745_s7 + $0x10] sm:$0xff]  }
 0x458   : > { %v1165_v9 = vpop.f32.mrf.mxu1 }
 0x459   : > { %v2158_v11 = vpack.i.bf16 %v1165_v9, %v1162_v6  ;;  %v2216_v6 = vld [vmem:[%s2745_s7 + $0x50] sm:$0xff]   ;;  %v2218_v9 = vld [vmem:[%s2745_s7 + $0x48] sm:$0xff]  }
 0x45a   : > { %v2112_v12 = vpop.f32.mrf.mxu1 }
 0x45b   : > { %2159 = vrot.lane.b32.xlu1 %v2158_v11, %s2299_s24  ;;  %v2220_v11 = vld [vmem:[%s2745_s7 + $0x40] sm:$0xff]  }
 0x45c   : > { %v1206_v13 = vpop.f32.mrf.mxu1  ;;  %v2221_v12 = vld [vmem:[%s2745_s7] sm:$0xff]  }
 0x45e   : > { %v2117_v14 = vpop.f32.mrf.mxu1 }
 0x45f   : > { %v2224_v14 = vld [vmem:[%s2747_s9 + $0x74] ss:$8 sps:$4 sm:$0xff]  }
 0x460   : > { %v1209_v15 = vpop.f32.mrf.mxu1  ;;  %1738 = vmatprep.subr.bf16.mxu0 %v2224_v14 }
 0x461   : > { %v2163_v16 = vpack.i.bf16 %v1209_v15, %v1206_v13  ;;  %v2222_v13 = vld [vmem:[%s2747_s9 + $0x70] ss:$8 sps:$4 sm:$0xff]   ;;  %v2227_v15 = vld [vmem:[%s2747_s9 + $0x64] ss:$8 sps:$4 sm:$0xff]  }
 0x462   : > { %v2118_v17 = vpop.f32.mrf.mxu1 }
 0x463   : > { %2164 = vrot.lane.b32.xlu0 %v2163_v16, %s2297_s22  ;;  %v2225_v16 = vld [vmem:[%s2747_s9 + $0x60] ss:$8 sps:$4 sm:$0xff]   ;;  %v2230_v17 = vld [vmem:[%s2747_s9 + $0x54] ss:$8 sps:$4 sm:$0xff]  }
 0x464   : > { %v1250_v3 = vpop.f32.mrf.mxu1 }
 0x466   : > { %v2123_v18 = vpop.f32.mrf.mxu1 }
 0x467   : > { %v2233_v18 = vld [vmem:[%s2747_s9 + $0x44] ss:$8 sps:$4 sm:$0xff]  }
 0x468   : > { %v1253_v19 = vpop.f32.mrf.mxu1 }
 0x469   : > { %v2168_v20 = vpack.i.bf16 %v1253_v19, %v1250_v3  ;;  %v2228_v3 = vld [vmem:[%s2747_s9 + $0x50] ss:$8 sps:$4 sm:$0xff]   ;;  %v2231_v19 = vld [vmem:[%s2747_s9 + $0x40] ss:$8 sps:$4 sm:$0xff]  }
 0x46a   : > { %v2124_v21 = vpop.f32.mrf.mxu1 }
 0x46b   : > { %2169 = vrot.lane.b32.xlu1 %v2168_v20, %s2298_s23  ;;  %v2236_v20 = vld [vmem:[%s2747_s9 + $0x34] ss:$8 sps:$4 sm:$0xff]   ;;  %v2234_v21 = vld [vmem:[%s2747_s9 + $0x30] ss:$8 sps:$4 sm:$0xff]  }
 0x4cd   : > { %v2160_v22 = vpop.permute.xlu1 %2159 }
 0x4ce   : > { %v2162_v24 = vunpack.i.h.bf16 %v2160_v22  ;;  %v2161_v25 = vunpack.i.l.bf16 %v2160_v22  ;;  %v2239_v22 = vld [vmem:[%s2747_s9 + $0x24] ss:$8 sps:$4 sm:$0xff]  }
 0x4d0   : > { %v1282_v31 = vsel %vm772_vm1, %v1121_v60, %v2162_v24  ;;  %v1281_v33 = vsel %vm772_vm1, %v1118_v58, %v2161_v25  ;;  %v2213_v58 = vld [vmem:[%s2745_s7 + $0x20] sm:$0xff]   ;;  %v2242_v24 = vld [vmem:[%s2747_s9 + $0x14] ss:$8 sps:$4 sm:$0xff]   ;;  %v2240_v25 = vld [vmem:[%s2747_s9 + $0x10] ss:$8 sps:$4 sm:$0xff]  }
 0x4d1   : > { %2046 = vmatpush3.bf16.xpose.msra.mxu1 %v2213_v58 }
 0x4d2   : > { %2047 = vmatprep.subr.bf16.mxu1 %v2214_v59 }
 0x4d5   : > { %v2165_v23 = vpop.permute.xlu0 %2164 }
 0x4d6   : > { %v2167_v26 = vunpack.i.h.bf16 %v2165_v23  ;;  %v2166_v29 = vunpack.i.l.bf16 %v2165_v23  ;;  %v2237_v23 = vld [vmem:[%s2747_s9 + $0x20] ss:$8 sps:$4 sm:$0xff]  }
 0x4d8   : > { %v1285_v36 = vsel %vm1283_vm5, %v1282_v31, %v2167_v26  ;;  %v1284_v37 = vsel %vm1283_vm5, %v1281_v33, %v2166_v29 }
 0x4d9   : > { %2048 = vmatpush3.bf16.xpose.msra.mxu1 %v2215_v5 }
 0x4da   : > { %2049 = vmatprep.subr.bf16.mxu1 %v2216_v6 }
 0x4dd   : > { %v2170_v30 = vpop.permute.xlu1 %2169 }
 0x4de   : > { %v2172_v34 = vunpack.i.h.bf16 %v2170_v30  ;;  %v2171_v35 = vunpack.i.l.bf16 %v2170_v30 }
 0x4e0   : > { %v1288_v38 = vsel %vm1286_vm6, %v1285_v36, %v2172_v34  ;;  %v1287_v52 = vsel %vm1286_vm6, %v1284_v37, %v2171_v35  ;;  %v1937_v37 = vld [vmem:[%s2743_s5] ss:$0 sm:$0xff] }
 0x4e1   : > { %v1289_v39 = vpack.c.bf16 %v1288_v38, %v1287_v52  ;;  %2050 = vmatpush3.bf16.xpose.msra.mxu1 %v2217_v7 }
 0x4e2   : > { %2051 = vmatprep.subr.bf16.mxu1 %v2218_v9 }
 0x4e3   : > { %2142 = vmatmul.mubr.bf16.vlgmr.msra.gmra.mxu0 %v1289_v39 }
 0x4e4   : > { %1739 = vmatpush1.bf16.xpose.msra.mxu0 %v2222_v13 }
 0x4e5   : > { %1740 = vmatprep.subr.bf16.mxu0 %v2227_v15 }
 0x4e9   : > { %2052 = vmatpush3.bf16.xpose.msra.mxu1 %v2219_v10 }
 0x4ea   : > { %2053 = vmatprep.subr.bf16.mxu1 %v2220_v11 }
 0x4ec   : > { %1741 = vmatpush1.bf16.xpose.msra.mxu0 %v2225_v16 }
 0x4ed   : > { %1742 = vmatprep.subr.bf16.mxu0 %v2230_v17 }
 0x4f1   : > { %2054 = vmatpush3.bf16.xpose.msra.mxu1 %v2221_v12 }
 0x4f4   : > { %1743 = vmatpush1.bf16.xpose.msra.mxu0 %v2228_v3 }
 0x4f5   : > { %1744 = vmatprep.subr.bf16.mxu0 %v2233_v18 }
 0x4fc   : > { %1745 = vmatpush1.bf16.xpose.msra.mxu0 %v2231_v19 }
 0x4fd   : > { %1746 = vmatprep.subr.bf16.mxu0 %v2236_v20 }
 0x504   : > { %1747 = vmatpush1.bf16.xpose.msra.mxu0 %v2234_v21 }
 0x505   : > { %1748 = vmatprep.subr.bf16.mxu0 %v2239_v22 }
 0x50c   : > { %1749 = vmatpush1.bf16.xpose.msra.mxu0 %v2237_v23  ;;  %v1972_v23 = vld [vmem:[%s2749_s11] ss:$0 sm:$0xff] }
 0x50d   : > { %1750 = vmatprep.subr.bf16.mxu0 %v2242_v24 }
 0x514   : > { %1751 = vmatpush1.bf16.xpose.msra.mxu0 %v2240_v25 }
 0x5a3   : > { %v1395_v42 = vpop.f32.mrf.mxu0 }
 0x5a4   : > { %v1396_v43 = vadd.f32 %v1928_v40, %v1395_v42 }
 0x5a5   : > { %v2143_v44 = vpop.f32.mrf.mxu0 }
 0x5a6   : > { %v1402_v45 = vadd.f32 %v1396_v43, %v444_v41 }
 0x5a7   : > { %v1398_v47 = vpop.f32.mrf.mxu0 }
 0x5a8   : > { %v1399_v48 = vadd.f32 %v1928_v40, %v1398_v47  ;;  %1404 = vadd.xlane.f32.xlu0 %v1402_v45  ;;  %v1938_v40 = vld [vmem:[%s2744_s6] ss:$0 sm:$0xff] }
 0x5a9   : > { %v2144_v49 = vpop.f32.mrf.mxu0  ;;  %v1478_v47 = vld [vmem:[%s2746_s8] sm:$0x3] }
 0x5aa   : > { %v1403_v50 = vadd.f32 %v1399_v48, %v445_v46  ;;  %v2243_v46 = vld [vmem:[%s2747_s9] ss:$8 sps:$4 sm:$0xff]   ;;  %v1487_v49 = vrot.slane %v1478_v47, %v502_v28 }
 0x5ac   : > { %1406 = vadd.xlane.f32.xlu1 %v1403_v50 }
 0x631   : > { %v1405_v60 = vpop.xlane.xlu0 %1404 }
 0x632   : > { %v1409_v61 = vmul.f32 0.0078125, %v1405_v60 }
 0x634   : > { %v1411_v62 = vsub.f32 %v1402_v45, %v1409_v61  ;;  %v2245_v45 = vld [vmem:[%s2747_s9 + $0x4] ss:$8 sps:$4 sm:$0xff]  }
 0x635   : > { %v1407_v63 = vpop.xlane.xlu1 %1406  ;;  %1752 = vmatprep.subr.bf16.mxu0 %v2245_v45 }
 0x636   : > { %v1410_v0 = vmul.f32 0.0078125, %v1407_v63  ;;  %v1413_v1 = vmul.f32 %v1411_v62, %v1411_v62  ;;  %1753 = vmatpush1.bf16.xpose.msra.mxu0 %v2243_v46 }
 0x638   : > { %v1412_v2 = vsub.f32 %v1403_v50, %v1410_v0  ;;  %1415 = vadd.xlane.f32.xlu0 %v1413_v1  ;;  %v1483_v50 = vrot.slane %v1478_v47, %v498_v32 }
 0x63a   : > { %v1414_v4 = vmul.f32 %v1412_v2, %v1412_v2 }
 0x63c   : > { %1417 = vadd.xlane.f32.xlu0 %v1414_v4 }
 0x6c1   : > { %v1416_v26 = vpop.xlane.xlu0 %1415 }
 0x6c2   : > { %v1419_v29 = vmul.f32 0.0078125, %v1416_v26 }
 0x6c4   : > { %v1421_v30 = vadd.f32 1e-05, %v1419_v29  ;;  %v1973_v29 = vld [vmem:[%s2750_s12] ss:$0 sm:$0xff] }
 0x6c5   : > { %v1418_v31 = vpop.xlane.xlu0 %1417 }
 0x6c6   : > { %2279 = vrsqrt.f32 %v1421_v30  ;;  %v1420_v33 = vmul.f32 0.0078125, %v1418_v31 }
 0x6c8   : > { %v1422_v34 = vadd.f32 1e-05, %v1420_v33 }
 0x6ca   : > { %2281 = vrsqrt.f32 %v1422_v34 }
 0x6d3   : > { %v2280_v35 = vpop.eup %2279 }
 0x6d4   : > { %v1425_v36 = vmul.f32 %v2280_v35, %v1411_v62 }
 0x6d6   : > { %v1434_v39 = vmul.f32 %v1937_v37, %v1425_v36 }
 0x6d7   : > { %v2282_v38 = vpop.eup %2281 }
 0x6d8   : > { %v1426_v52 = vmul.f32 %v2282_v38, %v1412_v2  ;;  %v1443_v42 = vadd.f32 %v1938_v40, %v1434_v39 }
 0x6da   : > { %v1435_v41 = vmul.f32 %v1937_v37, %v1426_v52 }
 0x6dc   : > { %v1444_v43 = vadd.f32 %v1938_v40, %v1435_v41 }
 0x6de   : > { %v1445_v44 = vpack.c.bf16 %v1444_v43, %v1443_v42 }
 0x6e0   : > { %2055 = vmatprep.mubr.bf16.mxu1 %v1445_v44 }
 0x6e1   : > { %2056 = vmatmul.mubr.bf16.vlgmr.msra.gmra.mxu1 %v1445_v44 }
 0x7a1   : > { %v1620_v48 = vpop.f32.mrf.mxu1 }
 0x7a2   : > { %v1621_v55 = vadd.f32 %v1620_v48, %v1483_v50 }
 0x7a3   : > { %v1622_v51 = vpop.f32.mrf.mxu1 }
 0x7a4   : > { %v1623_v54 = vadd.f32 %v1622_v51, %v1487_v49  ;;  %v1629_v61 = vmax.f32 %v1621_v55, 0.0 }
 0x7a5   : > { %v1624_v53 = vpop.f32.mrf.mxu1 }
 0x7a6   : > { %v1625_v8 = vadd.f32 %v1624_v53, %v1483_v50  ;;  %v1630_v59 = vmax.f32 %v1623_v54, 0.0 }
 0x7a7   : > { %v1626_v56 = vpop.f32.mrf.mxu1 }
 0x7a8   : > { %v1627_v57 = vadd.f32 %v1626_v56, %v1487_v49  ;;  %v1631_v58 = vmax.f32 %v1625_v8, 0.0 }
 0x7aa   : > { %v1632_v60 = vmax.f32 %v1627_v57, 0.0  ;;  %v1633_v63 = vpack.c.bf16 %v1631_v58, %v1629_v61 }
 0x7ac   : > { %v1634_v62 = vpack.c.bf16 %v1632_v60, %v1630_v59 }
 0x7ae   : > { %1770 = vmatprep.mubr.bf16.mxu0 %v1634_v62 }
 0x7af   : > { %1771 = vmatmul.mubr.bf16.vlgmr.msra.gmra.mxu0 %v1633_v63 }
 0x86f   : > { %v1772_v28 = vpop.f32.mrf.mxu0 }
 0x870   : > { %v1773_v32 = vadd.f32 %v1955_v27, %v1772_v28 }
 0x871   : > { %v1774_v0 = vpop.f32.mrf.mxu0 }
 0x872   : > { %v1779_v1 = vadd.f32 %v1773_v32, %v1443_v42 }
 0x873   : > { %v1775_v2 = vpop.f32.mrf.mxu0 }
 0x874   : > { %v1776_v4 = vadd.f32 %v1955_v27, %v1775_v2  ;;  %1781 = vadd.xlane.f32.xlu1 %v1779_v1 }
 0x875   : > { %v1777_v5 = vpop.f32.mrf.mxu0 }
 0x876   : > { %v1780_v6 = vadd.f32 %v1776_v4, %v1444_v43 }
 0x878   : > { %1783 = vadd.xlane.f32.xlu0 %v1780_v6 }
 0x8fd   : > { %v1782_v7 = vpop.xlane.xlu1 %1781 }
 0x8fe   : > { %v1785_v9 = vmul.f32 0.0078125, %v1782_v7 }
 0x900   : > { %v1787_v10 = vsub.f32 %v1779_v1, %v1785_v9 }
 0x901   : > { %v1784_v11 = vpop.xlane.xlu0 %1783 }
 0x902   : > { %v1786_v12 = vmul.f32 0.0078125, %v1784_v11  ;;  %v1789_v13 = vmul.f32 %v1787_v10, %v1787_v10 }
 0x904   : > { %v1788_v14 = vsub.f32 %v1780_v6, %v1786_v12  ;;  %1791 = vadd.xlane.f32.xlu1 %v1789_v13 }
 0x906   : > { %v1790_v15 = vmul.f32 %v1788_v14, %v1788_v14 }
 0x908   : > { %1793 = vadd.xlane.f32.xlu0 %v1790_v15 }
 0x98d   : > { %v1792_v16 = vpop.xlane.xlu1 %1791 }
 0x98e   : > { %v1795_v17 = vmul.f32 0.0078125, %v1792_v16 }
 0x990   : > { %v1797_v3 = vadd.f32 1e-05, %v1795_v17 }
 0x991   : > { %v1794_v18 = vpop.xlane.xlu0 %1793 }
 0x992   : > { %2283 = vrsqrt.f32 %v1797_v3  ;;  %v1796_v19 = vmul.f32 0.0078125, %v1794_v18 }
 0x994   : > { %v1798_v20 = vadd.f32 1e-05, %v1796_v19 }
 0x996   : > { %2285 = vrsqrt.f32 %v1798_v20 }
 0x99f   : > { %v2284_v21 = vpop.eup %2283 }
 0x9a0   : > { %v1801_v22 = vmul.f32 %v2284_v21, %v1787_v10 }
 0x9a2   : > { %v1810_v25 = vmul.f32 %v1972_v23, %v1801_v22 }
 0x9a3   : > { %v2286_v24 = vpop.eup %2285 }
 0x9a4   : > { %v1802_v26 = vmul.f32 %v2286_v24, %v1788_v14  ;;  %v1819_v31 = vadd.f32 %v1973_v29, %v1810_v25 }
 0x9a6   : > { %v1811_v30 = vmul.f32 %v1972_v23, %v1802_v26 }
 0x9a8   : > { %v1820_v33 = vadd.f32 %v1973_v29, %v1811_v30 }
 0x9aa   : > { %v1985_v34 = vpack.c.bf16 %v1820_v33, %v1819_v31 }
 0x9ac   : > { %1986 = vst [vmem:[%s440_s28] sm:$0xff] %v1985_v34  }
 0x9ad PF: > { %s23_s25 = sadd.s32 1, %s2293_s25  }
 0x9ae   : > { %p20_p4 = scmp.ge.s32.totalorder %s23_s25, 4  }
 0x9b0   :  { %22 = sbr.rel (!%p20_p4) target bundleno = 1 (0x1), region = 102 }

</bundles_post_ra>
